<compile_context>
chip_gen: v5e
topology: v5e:2x2
jax: 0.10.0
libtpu: 0.0.40
codegen_flags: <defaults>
</compile_context>

<pallas_src>
import math
import functools

import jax
import jax.numpy as jnp
from jax.experimental import pallas as pl
from jax.experimental.pallas import tpu as pltpu


LANE = 128      # TPU vreg lane width
SUBLANE = 8     # f32 sublane height


def _round_up(x, m):
    return (x + m - 1) // m * m


def _pad_to(x, axis, target):
    pad = target - x.shape[axis]
    if pad <= 0:
        return x
    cfg = [(0, 0)] * x.ndim
    cfg[axis] = (0, pad)
    return jnp.pad(x, cfg)


def _nbytes(a):
    return int(a.size) * a.dtype.itemsize


def _resident_spec(arr):
    """Full-array block whose index is constant across the grid -> stays in VMEM."""
    nd = arr.ndim
    return pl.BlockSpec(arr.shape, lambda b, _nd=nd: (0,) * _nd)


# ----------------------------------------------------------------------------
# Fused forward kernel: lat2hid -> n_layers x (masked conv + cross-attn) -> head
# One grid step == one batch element (whole target / source sequence).
# ----------------------------------------------------------------------------

def _score_fn_kernel(z_ref, ym_ref, xs_ref, xm_ref,
                     lat_w_ref, lat_b_ref,
                     cw_ref, cb_ref,
                     wq_ref, bq_ref, wkv_ref, bkv_ref,
                     wo_ref, bo_ref,
                     g1_ref, b1_ref, g2_ref, b2_ref,
                     hw_ref, hb_ref,
                     o_ref,
                     *, D_hid, positive):
    T = z_ref.shape[0]                  # padded target length for this sequence
    Dp = lat_w_ref.shape[1]             # padded hidden width (multiple of 128)
    L = cw_ref.shape[0]                 # number of encoder layers

    inv_d = 1.0 / D_hid
    scale = 1.0 / math.sqrt(D_hid)

    # Hoisted constants / broadcasts (JAX does not CSE broadcast_in_dim).
    lane_idx = jax.lax.broadcasted_iota(jnp.int32, (1, Dp), 1)
    lane_mask = (lane_idx < D_hid).astype(jnp.float32)   # zero padded lanes in LN
    row_idx = jax.lax.broadcasted_iota(jnp.int32, (T, 1), 0)
    prev_ok = row_idx != 0              # left conv tap valid (not first token)
    next_ok = row_idx != (T - 1)        # right conv tap valid (not last token)

    ym = ym_ref[...]                    # (T, 1)   f32
    xs = xs_ref[...]                    # (Txp, Dp) bf16
    xm_add = xm_ref[0]                  # (1, Txp) f32 additive mask (0 / -1e30)

    def layer_norm(x, g, b):
        # LN over the real D_hid lanes; padded lanes stay exactly zero.
        mu = jnp.sum(x, axis=-1, keepdims=True) * inv_d
        diff = (x - mu) * lane_mask
        var = jnp.sum(diff * diff, axis=-1, keepdims=True) * inv_d
        return diff * jax.lax.rsqrt(var + 1e-5) * g + b

    # --- lat2hid ---
    h = jnp.dot(z_ref[...], lat_w_ref[...],
                preferred_element_type=jnp.float32) + lat_b_ref[...]    # (T, Dp) f32

    # --- encoder stack; weights resident in VMEM, layers unrolled ---
    # TODO(synk): for large n_layers switch to lax.fori_loop over the stacked
    # (L, ...) weight refs to bound vreg live ranges / compile time.
    for l in range(L):
        # masked Conv1d(kernel=3, pad=1): neighbor shifts via XLU roll with
        # NON-NEGATIVE shifts (roll is cyclic: shift=T-1 == shift=-1), three
        # taps accumulated as three K=Dp matmuls (no tap concatenate).
        hm = h * ym
        h_prev = jnp.where(prev_ok, pltpu.roll(hm, shift=1, axis=0), 0.0)
        h_next = jnp.where(next_ok, pltpu.roll(hm, shift=T - 1, axis=0), 0.0)
        c = (jnp.dot(h_prev.astype(jnp.bfloat16), cw_ref[l, 0],
                     preferred_element_type=jnp.float32)
             + jnp.dot(hm.astype(jnp.bfloat16), cw_ref[l, 1],
                       preferred_element_type=jnp.float32)
             + jnp.dot(h_next.astype(jnp.bfloat16), cw_ref[l, 2],
                       preferred_element_type=jnp.float32)
             + cb_ref[l])
        c = jnp.maximum(c, 0.0)                                  # ReLU
        h1 = layer_norm(h + c, g1_ref[l], b1_ref[l])             # residual + LN

        # q projection (1/sqrt(D) folded into q) + fused k|v projection (N=2*Dp).
        h1_bf = h1.astype(jnp.bfloat16)
        q = (jnp.dot(h1_bf, wq_ref[l], preferred_element_type=jnp.float32)
             + bq_ref[l]) * scale
        kv = jnp.dot(xs, wkv_ref[l],
                     preferred_element_type=jnp.float32) + bkv_ref[l]   # (Txp, 2Dp)
        q_bf = q.astype(jnp.bfloat16)
        k_bf = kv[:, :Dp].astype(jnp.bfloat16)    # lane-tile-aligned slices
        v_bf = kv[:, Dp:].astype(jnp.bfloat16)

        # single-head cross-attention, one sequence -> plain 2-D matmuls
        s = jax.lax.dot_general(q_bf, k_bf, (((1,), (1,)), ((), ())),
                                preferred_element_type=jnp.float32)     # (T, Txp)
        s = s + xm_add                                   # -1e30 on masked keys
        m = jnp.max(s, axis=-1, keepdims=True)
        p = jnp.exp(s - m)
        denom = jnp.sum(p, axis=-1, keepdims=True)
        ctx = jax.lax.dot_general(p.astype(jnp.bfloat16), v_bf,
                                  (((1,), (0,)), ((), ())),
                                  preferred_element_type=jnp.float32)
        # TODO(synk): use approx=False if bit-tight parity vs PyTorch is needed.
        ctx = ctx * pl.reciprocal(denom, approx=True)
        ctx = jnp.dot(ctx.astype(jnp.bfloat16), wo_ref[l],
                      preferred_element_type=jnp.float32) + bo_ref[l]
        h = layer_norm(h1 + ctx, g2_ref[l], b2_ref[l])           # residual + LN

    # --- hid2score head: lane-dense padded output; wrapper slices back ---
    out = jnp.dot(h.astype(jnp.bfloat16), hw_ref[...],
                  preferred_element_type=jnp.float32) + hb_ref[...]
    if positive:
        out = jax.nn.softplus(out)
    o_ref[...] = (out * ym).astype(o_ref.dtype)


# ----------------------------------------------------------------------------
# Wrapper: pad/pack params + activations, single pallas_call over the batch
# ----------------------------------------------------------------------------

def score_fn_forward(params, z, y_mask, x_states, x_mask, positive=False):
    B, Ty, D_lat = z.shape
    Tx = x_states.shape[1]
    D_hid = params["lat2hid"][0].shape[1]
    D_fin = params["hid2score"][0].shape[1]
    L = len(params["layers"])

    Dp = _round_up(D_hid, LANE)        # lane-dense hidden width
    Dfp = _round_up(D_fin, LANE)       # lane-dense output width
    Dlp = _round_up(D_lat, LANE)       # lane-dense latent width
    Typ = _round_up(Ty, SUBLANE)       # sublane-aligned target length
    Txp = _round_up(Tx, LANE)          # lane-aligned source length (softmax lane dim)

    # --- pack / pad parameters (zero-padding keeps the math exact) ---
    lw, lb = params["lat2hid"]
    lat_w = _pad_to(_pad_to(lw, 0, Dlp), 1, Dp).astype(jnp.bfloat16)
    lat_b = _pad_to(lb, 1, Dp).astype(jnp.float32)

    cw_l, cb_l = [], []
    wq_l, bq_l, wkv_l, bkv_l, wo_l, bo_l = [], [], [], [], [], []
    g1_l, b1_l, g2_l, b2_l = [], [], [], []
    for (cw_, cb_, wq_, bq_, wk_, bk_, wv_, bv_, wo_, bo_, g1_, b1_, g2_, b2_) \
            in params["layers"]:
        cw_l.append(jnp.stack(
            [_pad_to(_pad_to(cw_[t], 0, Dp), 1, Dp) for t in range(3)], axis=0))
        cb_l.append(_pad_to(cb_, 1, Dp))
        wq_l.append(_pad_to(_pad_to(wq_, 0, Dp), 1, Dp))
        bq_l.append(_pad_to(bq_, 1, Dp))
        # fuse k|v along the output axis -> one N=2*Dp matmul per layer
        wkv_l.append(jnp.concatenate(
            [_pad_to(_pad_to(wk_, 0, Dp), 1, Dp),
             _pad_to(_pad_to(wv_, 0, Dp), 1, Dp)], axis=1))
        bkv_l.append(jnp.concatenate(
            [_pad_to(bk_, 1, Dp), _pad_to(bv_, 1, Dp)], axis=1))
        wo_l.append(_pad_to(_pad_to(wo_, 0, Dp), 1, Dp))
        bo_l.append(_pad_to(bo_, 1, Dp))
        g1_l.append(_pad_to(g1_, 1, Dp)); b1_l.append(_pad_to(b1_, 1, Dp))
        g2_l.append(_pad_to(g2_, 1, Dp)); b2_l.append(_pad_to(b2_, 1, Dp))

    def stack_w(lst):   # weights in bf16
        return jnp.stack(lst).astype(jnp.bfloat16)

    def stack_b(lst):   # biases / LN params in f32
        return jnp.stack(lst).astype(jnp.float32)

    cw = stack_w(cw_l); cb = stack_b(cb_l)               # (L,3,Dp,Dp) / (L,1,Dp)
    wq = stack_w(wq_l); bq = stack_b(bq_l)               # (L,Dp,Dp)   / (L,1,Dp)
    wkv = stack_w(wkv_l); bkv = stack_b(bkv_l)           # (L,Dp,2Dp)  / (L,1,2Dp)
    wo = stack_w(wo_l); bo = stack_b(bo_l)
    g1 = stack_b(g1_l); b1 = stack_b(b1_l)
    g2 = stack_b(g2_l); b2 = stack_b(b2_l)

    hw, hb = params["hid2score"]
    head_w = _pad_to(_pad_to(hw, 0, Dp), 1, Dfp).astype(jnp.bfloat16)
    head_b = _pad_to(hb, 1, Dfp).astype(jnp.float32)

    # --- pack / pad activations ---
    z2 = _pad_to(_pad_to(z, 1, Typ), 2, Dlp).reshape(B * Typ, Dlp).astype(jnp.bfloat16)
    ym = _pad_to(y_mask, 1, Typ).reshape(B * Typ, 1).astype(jnp.float32)
    xs = _pad_to(_pad_to(x_states, 1, Txp), 2, Dp).reshape(B * Txp, Dp).astype(jnp.bfloat16)
    # additive key mask: 0 for valid, -1e30 for masked/padded (hoisted out of kernel)
    xm_add = ((_pad_to(x_mask, 1, Txp) - 1.0) * 1e30).reshape(B, 1, Txp).astype(jnp.float32)

    args = (z2, ym, xs, xm_add,
            lat_w, lat_b, cw, cb, wq, bq, wkv, bkv, wo, bo,
            g1, b1, g2, b2, head_w, head_b)

    # Per-sequence (row-blocked) activation specs; weights resident (constant index).
    act_specs = [
        pl.BlockSpec((Typ, Dlp), lambda b: (b, 0)),      # z2
        pl.BlockSpec((Typ, 1), lambda b: (b, 0)),        # ym
        pl.BlockSpec((Txp, Dp), lambda b: (b, 0)),       # xs
        pl.BlockSpec((1, 1, Txp), lambda b: (b, 0, 0)),  # xm_add
    ]
    weight_specs = [_resident_spec(a) for a in args[4:]]
    # TODO(synk): for very large models, move weights to memory_space=pl.ANY and
    # stream layer l+1's weights into a 2-deep VMEM scratch while computing layer l.

    # Explicit VMEM budget: double-buffered weights + activations + scratch headroom.
    weight_bytes = sum(_nbytes(a) for a in args[4:])
    act_block_bytes = (Typ * Dlp * 2 + Typ * 4 + Txp * Dp * 2 + Txp * 4
                       + Typ * Dfp * 4)
    scratch_bytes = (8 * Typ * Dp * 4        # h / taps / h1 / q / ctx intermediates
                     + Txp * 2 * Dp * 4      # kv
                     + 2 * Typ * Txp * 4)    # scores / probs
    vmem_needed = 2 * weight_bytes + 2 * 2 * act_block_bytes + 4 * scratch_bytes
    vmem_limit = int(min(max(vmem_needed + (4 << 20), 32 << 20), 64 << 20))

    # Cost estimate so XLA schedules the (opaque) fused call sensibly.
    flops_seq = 2 * Typ * Dlp * Dp
    flops_seq += L * (3 * 2 * Typ * Dp * Dp       # conv taps
                      + 2 * Typ * Dp * Dp         # q
                      + 2 * Txp * Dp * (2 * Dp)   # fused k|v
                      + 2 * Typ * Txp * Dp        # scores
                      + 2 * Typ * Txp * Dp        # p @ v
                      + 2 * Typ * Dp * Dp)        # output proj
    flops_seq += 2 * Typ * Dp * Dfp
    cost = pl.CostEstimate(
        flops=B * flops_seq,
        transcendentals=B * L * Typ * Txp,
        bytes_accessed=sum(_nbytes(a) for a in args) + B * Typ * Dfp * 4)

    out = pl.pallas_call(
        functools.partial(_score_fn_kernel, D_hid=D_hid, positive=positive),
        out_shape=jax.ShapeDtypeStruct((B * Typ, Dfp), jnp.float32),
        grid=(B,),
        in_specs=act_specs + weight_specs,
        out_specs=pl.BlockSpec((Typ, Dfp), lambda b: (b, 0)),
        compiler_params=pltpu.CompilerParams(
            dimension_semantics=("parallel",),      # megacore over the batch axis
            vmem_limit_bytes=vmem_limit,
        ),
        cost_estimate=cost,
    )(*args)

    return out.reshape(B, Typ, Dfp)[:, :Ty, :D_fin]


# ----------------------------------------------------------------------------
# Parameter init (deterministic, synthetic, real/unpadded shapes)
# ----------------------------------------------------------------------------

def init_params(key, D_lat, D_hid, D_fin, n_layers):
    keys = iter(jax.random.split(key, 8 + 12 * n_layers))

    def lin(din, dout):
        s = 1.0 / math.sqrt(din)
        w = jax.random.uniform(next(keys), (din, dout), jnp.float32, -s, s)
        b = jax.random.uniform(next(keys), (1, dout), jnp.float32, -s, s)
        return w, b

    params = {"lat2hid": lin(D_lat, D_hid)}
    layers = []
    for _ in range(n_layers):
        s = 1.0 / math.sqrt(3 * D_hid)
        cw = jax.random.uniform(next(keys), (3, D_hid, D_hid), jnp.float32, -s, s)
        cb = jax.random.uniform(next(keys), (1, D_hid), jnp.float32, -s, s)
        wq, bq = lin(D_hid, D_hid)
        wk, bk = lin(D_hid, D_hid)
        wv, bv = lin(D_hid, D_hid)
        wo, bo = lin(D_hid, D_hid)
        g1, b1 = jnp.ones((1, D_hid)), jnp.zeros((1, D_hid))
        g2, b2 = jnp.ones((1, D_hid)), jnp.zeros((1, D_hid))
        layers.append((cw, cb, wq, bq, wk, bk, wv, bv, wo, bo, g1, b1, g2, b2))
    params["layers"] = layers
    params["hid2score"] = lin(D_hid, D_fin)
    return params


if __name__ == "__main__":
    B, Ty, Tx = 2, 8, 12
    D_lat, D_hid, D_fin, n_layers = 16, 32, 8, 2

    key = jax.random.PRNGKey(0)
    kz, kx, kp = jax.random.split(key, 3)

    z = jax.random.normal(kz, (B, Ty, D_lat), jnp.float32)
    x_states = jax.random.normal(kx, (B, Tx, D_hid), jnp.float32)
    y_lens = jnp.array([Ty, Ty - 3])
    x_lens = jnp.array([Tx, Tx - 4])
    y_mask = (jnp.arange(Ty)[None, :] < y_lens[:, None]).astype(jnp.float32)
    x_mask = (jnp.arange(Tx)[None, :] < x_lens[:, None]).astype(jnp.float32)

    params = init_params(kp, D_lat, D_hid, D_fin, n_layers)

    fwd = jax.jit(score_fn_forward, static_argnames=("positive",))
    out = fwd(params, z, y_mask, x_states, x_mask, positive=False)
    out = jax.block_until_ready(out)

    assert out.shape == (B, Ty, D_fin)
    assert bool(jnp.all(jnp.isfinite(out)))
    # masked target positions must be exactly zero
    assert bool(jnp.all(jnp.where(y_mask[:, :, None] == 0.0, out == 0.0, True)))
    print("KERNEL_OK")
</pallas_src>

<mosaic_0001>
module attributes {stable_mosaic.version = 11 : i64} {
  func.func @_score_fn_kernel(%arg0: i32, %arg1: memref<8x128xbf16, #tpu.memory_space<vmem>>, %arg2: memref<8x1xf32, #tpu.memory_space<vmem>>, %arg3: memref<128x128xbf16, #tpu.memory_space<vmem>>, %arg4: memref<1x1x128xf32, #tpu.memory_space<vmem>>, %arg5: memref<128x128xbf16, #tpu.memory_space<vmem>>, %arg6: memref<1x128xf32, #tpu.memory_space<vmem>>, %arg7: memref<2x3x128x128xbf16, #tpu.memory_space<vmem>>, %arg8: memref<2x1x128xf32, #tpu.memory_space<vmem>>, %arg9: memref<2x128x128xbf16, #tpu.memory_space<vmem>>, %arg10: memref<2x1x128xf32, #tpu.memory_space<vmem>>, %arg11: memref<2x128x256xbf16, #tpu.memory_space<vmem>>, %arg12: memref<2x1x256xf32, #tpu.memory_space<vmem>>, %arg13: memref<2x128x128xbf16, #tpu.memory_space<vmem>>, %arg14: memref<2x1x128xf32, #tpu.memory_space<vmem>>, %arg15: memref<2x1x128xf32, #tpu.memory_space<vmem>>, %arg16: memref<2x1x128xf32, #tpu.memory_space<vmem>>, %arg17: memref<2x1x128xf32, #tpu.memory_space<vmem>>, %arg18: memref<2x1x128xf32, #tpu.memory_space<vmem>>, %arg19: memref<128x128xbf16, #tpu.memory_space<vmem>>, %arg20: memref<1x128xf32, #tpu.memory_space<vmem>>, %arg21: memref<8x128xf32, #tpu.memory_space<vmem>>) attributes {dimension_semantics = [#tpu.dimension_semantics<parallel>], iteration_bounds = array<i64: 2>, scalar_prefetch = 0 : i64, scratch_operands = 0 : i64, tpu.core_type = #tpu.core_type<tc>, window_params = [{transform_indices = @transform_0, window_bounds = array<i64: 8, 128>}, {transform_indices = @transform_1, window_bounds = array<i64: 8, 1>}, {transform_indices = @transform_2, window_bounds = array<i64: 128, 128>}, {transform_indices = @transform_3, window_bounds = array<i64: 1, 1, 128>}, {pipeline_mode = #tpu.pipeline_mode<synchronous>, transform_indices = @transform_4, window_bounds = array<i64: 128, 128>}, {pipeline_mode = #tpu.pipeline_mode<synchronous>, transform_indices = @transform_5, window_bounds = array<i64: 1, 128>}, {pipeline_mode = #tpu.pipeline_mode<synchronous>, transform_indices = @transform_6, window_bounds = array<i64: 2, 3, 128, 128>}, {pipeline_mode = #tpu.pipeline_mode<synchronous>, transform_indices = @transform_7, window_bounds = array<i64: 2, 1, 128>}, {pipeline_mode = #tpu.pipeline_mode<synchronous>, transform_indices = @transform_8, window_bounds = array<i64: 2, 128, 128>}, {pipeline_mode = #tpu.pipeline_mode<synchronous>, transform_indices = @transform_9, window_bounds = array<i64: 2, 1, 128>}, {pipeline_mode = #tpu.pipeline_mode<synchronous>, transform_indices = @transform_10, window_bounds = array<i64: 2, 128, 256>}, {pipeline_mode = #tpu.pipeline_mode<synchronous>, transform_indices = @transform_11, window_bounds = array<i64: 2, 1, 256>}, {pipeline_mode = #tpu.pipeline_mode<synchronous>, transform_indices = @transform_12, window_bounds = array<i64: 2, 128, 128>}, {pipeline_mode = #tpu.pipeline_mode<synchronous>, transform_indices = @transform_13, window_bounds = array<i64: 2, 1, 128>}, {pipeline_mode = #tpu.pipeline_mode<synchronous>, transform_indices = @transform_14, window_bounds = array<i64: 2, 1, 128>}, {pipeline_mode = #tpu.pipeline_mode<synchronous>, transform_indices = @transform_15, window_bounds = array<i64: 2, 1, 128>}, {pipeline_mode = #tpu.pipeline_mode<synchronous>, transform_indices = @transform_16, window_bounds = array<i64: 2, 1, 128>}, {pipeline_mode = #tpu.pipeline_mode<synchronous>, transform_indices = @transform_17, window_bounds = array<i64: 2, 1, 128>}, {pipeline_mode = #tpu.pipeline_mode<synchronous>, transform_indices = @transform_18, window_bounds = array<i64: 128, 128>}, {pipeline_mode = #tpu.pipeline_mode<synchronous>, transform_indices = @transform_19, window_bounds = array<i64: 1, 128>}, {transform_indices = @transform_20, window_bounds = array<i64: 8, 128>}]} {
    %0 = tpu.iota {dimensions = array<i32: 1>} : vector<1x128xi32>
    %c32_i32 = arith.constant 32 : i32
    %1 = vector.broadcast %c32_i32 : i32 to vector<1x128xi32>
    %2 = arith.cmpi slt, %0, %1 : vector<1x128xi32>
    %3 = arith.extui %2 : vector<1x128xi1> to vector<1x128xi32>
    %4 = arith.sitofp %3 : vector<1x128xi32> to vector<1x128xf32>
    %5 = tpu.iota {dimensions = array<i32: 0>} : vector<8x1xi32>
    %c0_i32 = arith.constant 0 : i32
    %6 = vector.broadcast %c0_i32 : i32 to vector<8x1xi32>
    %7 = arith.cmpi ne, %5, %6 : vector<8x1xi32>
    %c7_i32 = arith.constant 7 : i32
    %8 = vector.broadcast %c7_i32 : i32 to vector<8x1xi32>
    %9 = arith.cmpi ne, %5, %8 : vector<8x1xi32>
    %c0 = arith.constant 0 : index
    %c0_0 = arith.constant 0 : index
    %10 = vector.load %arg2[%c0, %c0_0] : memref<8x1xf32, #tpu.memory_space<vmem>>, vector<8x1xf32>
    %c0_1 = arith.constant 0 : index
    %c0_2 = arith.constant 0 : index
    %11 = vector.load %arg3[%c0_1, %c0_2] : memref<128x128xbf16, #tpu.memory_space<vmem>>, vector<128x128xbf16>
    %c0_3 = arith.constant 0 : index
    %c0_4 = arith.constant 0 : index
    %c0_5 = arith.constant 0 : index
    %12 = vector.load %arg4[%c0_3, %c0_4, %c0_5] : memref<1x1x128xf32, #tpu.memory_space<vmem>>, vector<1x1x128xf32>
    %13 = vector.shape_cast %12 : vector<1x1x128xf32> to vector<1x128xf32>
    %c0_6 = arith.constant 0 : index
    %c0_7 = arith.constant 0 : index
    %14 = vector.load %arg1[%c0_6, %c0_7] : memref<8x128xbf16, #tpu.memory_space<vmem>>, vector<8x128xbf16>
    %c0_8 = arith.constant 0 : index
    %c0_9 = arith.constant 0 : index
    %15 = vector.load %arg5[%c0_8, %c0_9] : memref<128x128xbf16, #tpu.memory_space<vmem>>, vector<128x128xbf16>
    %cst = arith.constant dense<0.000000e+00> : vector<8x128xf32>
    %16 = tpu.matmul %14, %15, %cst {dimension_numbers = #tpu.dot_dimension_numbers<[1], [0], [0], [1], [0, 0, 1, 1], [], []>} : vector<8x128xbf16>, vector<128x128xbf16>, vector<8x128xf32> -> vector<8x128xf32>
    %c0_10 = arith.constant 0 : index
    %c0_11 = arith.constant 0 : index
    %17 = vector.load %arg6[%c0_10, %c0_11] : memref<1x128xf32, #tpu.memory_space<vmem>>, vector<1x128xf32>
    %18 = vector.broadcast %17 : vector<1x128xf32> to vector<8x128xf32>
    %19 = arith.addf %16, %18 : vector<8x128xf32>
    %20 = vector.broadcast %10 : vector<8x1xf32> to vector<8x128xf32>
    %21 = arith.mulf %19, %20 : vector<8x128xf32>
    %c1_i32 = arith.constant 1 : i32
    %22 = tpu.dynamic_rotate %21 by %c1_i32 dim 0 : vector<8x128xf32>, i32 -> vector<8x128xf32>
    %cst_12 = arith.constant 0.000000e+00 : f32
    %23 = vector.shape_cast %7 : vector<8x1xi1> to vector<8x1xi1>
    %24 = vector.broadcast %23 : vector<8x1xi1> to vector<8x128xi1>
    %25 = vector.broadcast %cst_12 : f32 to vector<8x128xf32>
    %26 = arith.select %24, %22, %25 : vector<8x128xi1>, vector<8x128xf32>
    %c7_i32_13 = arith.constant 7 : i32
    %27 = tpu.dynamic_rotate %21 by %c7_i32_13 dim 0 : vector<8x128xf32>, i32 -> vector<8x128xf32>
    %cst_14 = arith.constant 0.000000e+00 : f32
    %28 = vector.shape_cast %9 : vector<8x1xi1> to vector<8x1xi1>
    %29 = vector.broadcast %28 : vector<8x1xi1> to vector<8x128xi1>
    %30 = vector.broadcast %cst_14 : f32 to vector<8x128xf32>
    %31 = arith.select %29, %27, %30 : vector<8x128xi1>, vector<8x128xf32>
    %32 = arith.truncf %26 : vector<8x128xf32> to vector<8x128xbf16>
    %c0_15 = arith.constant 0 : index
    %c0_16 = arith.constant 0 : index
    %c0_17 = arith.constant 0 : index
    %c0_18 = arith.constant 0 : index
    %33 = vector.load %arg7[%c0_15, %c0_16, %c0_17, %c0_18] : memref<2x3x128x128xbf16, #tpu.memory_space<vmem>>, vector<1x1x128x128xbf16>
    %34 = vector.shape_cast %33 : vector<1x1x128x128xbf16> to vector<128x128xbf16>
    %cst_19 = arith.constant dense<0.000000e+00> : vector<8x128xf32>
    %35 = tpu.matmul %32, %34, %cst_19 {dimension_numbers = #tpu.dot_dimension_numbers<[1], [0], [0], [1], [0, 0, 1, 1], [], []>} : vector<8x128xbf16>, vector<128x128xbf16>, vector<8x128xf32> -> vector<8x128xf32>
    %36 = arith.truncf %21 : vector<8x128xf32> to vector<8x128xbf16>
    %c0_20 = arith.constant 0 : index
    %c1 = arith.constant 1 : index
    %c0_21 = arith.constant 0 : index
    %c0_22 = arith.constant 0 : index
    %37 = vector.load %arg7[%c0_20, %c1, %c0_21, %c0_22] : memref<2x3x128x128xbf16, #tpu.memory_space<vmem>>, vector<1x1x128x128xbf16>
    %38 = vector.shape_cast %37 : vector<1x1x128x128xbf16> to vector<128x128xbf16>
    %cst_23 = arith.constant dense<0.000000e+00> : vector<8x128xf32>
    %39 = tpu.matmul %36, %38, %cst_23 {dimension_numbers = #tpu.dot_dimension_numbers<[1], [0], [0], [1], [0, 0, 1, 1], [], []>} : vector<8x128xbf16>, vector<128x128xbf16>, vector<8x128xf32> -> vector<8x128xf32>
    %40 = arith.addf %35, %39 : vector<8x128xf32>
    %41 = arith.truncf %31 : vector<8x128xf32> to vector<8x128xbf16>
    %c0_24 = arith.constant 0 : index
    %c2 = arith.constant 2 : index
    %c0_25 = arith.constant 0 : index
    %c0_26 = arith.constant 0 : index
    %42 = vector.load %arg7[%c0_24, %c2, %c0_25, %c0_26] : memref<2x3x128x128xbf16, #tpu.memory_space<vmem>>, vector<1x1x128x128xbf16>
    %43 = vector.shape_cast %42 : vector<1x1x128x128xbf16> to vector<128x128xbf16>
    %cst_27 = arith.constant dense<0.000000e+00> : vector<8x128xf32>
    %44 = tpu.matmul %41, %43, %cst_27 {dimension_numbers = #tpu.dot_dimension_numbers<[1], [0], [0], [1], [0, 0, 1, 1], [], []>} : vector<8x128xbf16>, vector<128x128xbf16>, vector<8x128xf32> -> vector<8x128xf32>
    %45 = arith.addf %40, %44 : vector<8x128xf32>
    %c0_28 = arith.constant 0 : index
    %c0_29 = arith.constant 0 : index
    %c0_30 = arith.constant 0 : index
    %46 = vector.load %arg8[%c0_28, %c0_29, %c0_30] : memref<2x1x128xf32, #tpu.memory_space<vmem>>, vector<1x1x128xf32>
    %47 = vector.shape_cast %46 : vector<1x1x128xf32> to vector<1x128xf32>
    %48 = vector.broadcast %47 : vector<1x128xf32> to vector<8x128xf32>
    %49 = arith.addf %45, %48 : vector<8x128xf32>
    %cst_31 = arith.constant 0.000000e+00 : f32
    %50 = vector.broadcast %cst_31 : f32 to vector<8x128xf32>
    %51 = arith.maximumf %49, %50 : vector<8x128xf32>
    %52 = arith.addf %19, %51 : vector<8x128xf32>
    %c0_32 = arith.constant 0 : index
    %c0_33 = arith.constant 0 : index
    %c0_34 = arith.constant 0 : index
    %53 = vector.load %arg15[%c0_32, %c0_33, %c0_34] : memref<2x1x128xf32, #tpu.memory_space<vmem>>, vector<1x1x128xf32>
    %54 = vector.shape_cast %53 : vector<1x1x128xf32> to vector<1x128xf32>
    %c0_35 = arith.constant 0 : index
    %c0_36 = arith.constant 0 : index
    %c0_37 = arith.constant 0 : index
    %55 = vector.load %arg16[%c0_35, %c0_36, %c0_37] : memref<2x1x128xf32, #tpu.memory_space<vmem>>, vector<1x1x128xf32>
    %56 = vector.shape_cast %55 : vector<1x1x128xf32> to vector<1x128xf32>
    %cst_38 = arith.constant dense<0.000000e+00> : vector<8xf32>
    %57 = vector.multi_reduction <add>, %52, %cst_38 [1] : vector<8x128xf32> to vector<8xf32>
    %58 = vector.shape_cast %57 : vector<8xf32> to vector<8x1xf32>
    %cst_39 = arith.constant 3.125000e-02 : f32
    %59 = vector.broadcast %cst_39 : f32 to vector<8x1xf32>
    %60 = arith.mulf %58, %59 : vector<8x1xf32>
    %61 = vector.broadcast %60 : vector<8x1xf32> to vector<8x128xf32>
    %62 = arith.subf %52, %61 : vector<8x128xf32>
    %63 = vector.broadcast %4 : vector<1x128xf32> to vector<8x128xf32>
    %64 = arith.mulf %62, %63 : vector<8x128xf32>
    %65 = arith.mulf %64, %64 : vector<8x128xf32>
    %cst_40 = arith.constant dense<0.000000e+00> : vector<8xf32>
    %66 = vector.multi_reduction <add>, %65, %cst_40 [1] : vector<8x128xf32> to vector<8xf32>
    %67 = vector.shape_cast %66 : vector<8xf32> to vector<8x1xf32>
    %cst_41 = arith.constant 3.125000e-02 : f32
    %68 = vector.broadcast %cst_41 : f32 to vector<8x1xf32>
    %69 = arith.mulf %67, %68 : vector<8x1xf32>
    %cst_42 = arith.constant 9.99999974E-6 : f32
    %70 = vector.broadcast %cst_42 : f32 to vector<8x1xf32>
    %71 = arith.addf %69, %70 : vector<8x1xf32>
    %72 = math.rsqrt %71 : vector<8x1xf32>
    %73 = vector.broadcast %72 : vector<8x1xf32> to vector<8x128xf32>
    %74 = arith.mulf %64, %73 : vector<8x128xf32>
    %75 = vector.broadcast %54 : vector<1x128xf32> to vector<8x128xf32>
    %76 = arith.mulf %74, %75 : vector<8x128xf32>
    %77 = vector.broadcast %56 : vector<1x128xf32> to vector<8x128xf32>
    %78 = arith.addf %76, %77 : vector<8x128xf32>
    %79 = arith.truncf %78 : vector<8x128xf32> to vector<8x128xbf16>
    %c0_43 = arith.constant 0 : index
    %c0_44 = arith.constant 0 : index
    %c0_45 = arith.constant 0 : index
    %80 = vector.load %arg9[%c0_43, %c0_44, %c0_45] : memref<2x128x128xbf16, #tpu.memory_space<vmem>>, vector<1x128x128xbf16>
    %81 = vector.shape_cast %80 : vector<1x128x128xbf16> to vector<128x128xbf16>
    %cst_46 = arith.constant dense<0.000000e+00> : vector<8x128xf32>
    %82 = tpu.matmul %79, %81, %cst_46 {dimension_numbers = #tpu.dot_dimension_numbers<[1], [0], [0], [1], [0, 0, 1, 1], [], []>} : vector<8x128xbf16>, vector<128x128xbf16>, vector<8x128xf32> -> vector<8x128xf32>
    %c0_47 = arith.constant 0 : index
    %c0_48 = arith.constant 0 : index
    %c0_49 = arith.constant 0 : index
    %83 = vector.load %arg10[%c0_47, %c0_48, %c0_49] : memref<2x1x128xf32, #tpu.memory_space<vmem>>, vector<1x1x128xf32>
    %84 = vector.shape_cast %83 : vector<1x1x128xf32> to vector<1x128xf32>
    %85 = vector.broadcast %84 : vector<1x128xf32> to vector<8x128xf32>
    %86 = arith.addf %82, %85 : vector<8x128xf32>
    %cst_50 = arith.constant 0.176776692 : f32
    %87 = vector.broadcast %cst_50 : f32 to vector<8x128xf32>
    %88 = arith.mulf %86, %87 : vector<8x128xf32>
    %c0_51 = arith.constant 0 : index
    %c0_52 = arith.constant 0 : index
    %c0_53 = arith.constant 0 : index
    %89 = vector.load %arg11[%c0_51, %c0_52, %c0_53] : memref<2x128x256xbf16, #tpu.memory_space<vmem>>, vector<1x128x256xbf16>
    %90 = vector.shape_cast %89 : vector<1x128x256xbf16> to vector<128x256xbf16>
    %cst_54 = arith.constant dense<0.000000e+00> : vector<128x256xf32>
    %91 = tpu.matmul %11, %90, %cst_54 {dimension_numbers = #tpu.dot_dimension_numbers<[1], [0], [0], [1], [0, 0, 1, 1], [], []>} : vector<128x128xbf16>, vector<128x256xbf16>, vector<128x256xf32> -> vector<128x256xf32>
    %c0_55 = arith.constant 0 : index
    %c0_56 = arith.constant 0 : index
    %c0_57 = arith.constant 0 : index
    %92 = vector.load %arg12[%c0_55, %c0_56, %c0_57] : memref<2x1x256xf32, #tpu.memory_space<vmem>>, vector<1x1x256xf32>
    %93 = vector.shape_cast %92 : vector<1x1x256xf32> to vector<1x256xf32>
    %94 = vector.broadcast %93 : vector<1x256xf32> to vector<128x256xf32>
    %95 = arith.addf %91, %94 : vector<128x256xf32>
    %96 = arith.truncf %88 : vector<8x128xf32> to vector<8x128xbf16>
    %97 = vector.extract_strided_slice %95 {offsets = [0, 0], sizes = [128, 128], strides = [1, 1]} : vector<128x256xf32> to vector<128x128xf32>
    %98 = arith.truncf %97 : vector<128x128xf32> to vector<128x128xbf16>
    %99 = vector.extract_strided_slice %95 {offsets = [0, 128], sizes = [128, 128], strides = [1, 1]} : vector<128x256xf32> to vector<128x128xf32>
    %100 = arith.truncf %99 : vector<128x128xf32> to vector<128x128xbf16>
    %cst_58 = arith.constant dense<0.000000e+00> : vector<8x128xf32>
    %101 = tpu.matmul %96, %98, %cst_58 {dimension_numbers = #tpu.dot_dimension_numbers<[1], [1], [0], [0], [0, 0, 1, 0], [], []>} : vector<8x128xbf16>, vector<128x128xbf16>, vector<8x128xf32> -> vector<8x128xf32>
    %102 = vector.broadcast %13 : vector<1x128xf32> to vector<8x128xf32>
    %103 = arith.addf %101, %102 : vector<8x128xf32>
    %cst_59 = arith.constant dense<0xFF800000> : vector<8xf32>
    %104 = vector.multi_reduction <maximumf>, %103, %cst_59 [1] : vector<8x128xf32> to vector<8xf32>
    %105 = vector.shape_cast %104 : vector<8xf32> to vector<8x1xf32>
    %106 = vector.broadcast %105 : vector<8x1xf32> to vector<8x128xf32>
    %107 = arith.subf %103, %106 : vector<8x128xf32>
    %108 = math.exp %107 : vector<8x128xf32>
    %cst_60 = arith.constant dense<0.000000e+00> : vector<8xf32>
    %109 = vector.multi_reduction <add>, %108, %cst_60 [1] : vector<8x128xf32> to vector<8xf32>
    %110 = vector.shape_cast %109 : vector<8xf32> to vector<8x1xf32>
    %111 = arith.truncf %108 : vector<8x128xf32> to vector<8x128xbf16>
    %cst_61 = arith.constant dense<0.000000e+00> : vector<8x128xf32>
    %112 = tpu.matmul %111, %100, %cst_61 {dimension_numbers = #tpu.dot_dimension_numbers<[1], [0], [0], [1], [0, 0, 1, 1], [], []>} : vector<8x128xbf16>, vector<128x128xbf16>, vector<8x128xf32> -> vector<8x128xf32>
    %113 = tpu.reciprocal %110 {approx = true} : vector<8x1xf32> -> vector<8x1xf32>
    %114 = vector.broadcast %113 : vector<8x1xf32> to vector<8x128xf32>
    %115 = arith.mulf %112, %114 : vector<8x128xf32>
    %116 = arith.truncf %115 : vector<8x128xf32> to vector<8x128xbf16>
    %c0_62 = arith.constant 0 : index
    %c0_63 = arith.constant 0 : index
    %c0_64 = arith.constant 0 : index
    %117 = vector.load %arg13[%c0_62, %c0_63, %c0_64] : memref<2x128x128xbf16, #tpu.memory_space<vmem>>, vector<1x128x128xbf16>
    %118 = vector.shape_cast %117 : vector<1x128x128xbf16> to vector<128x128xbf16>
    %cst_65 = arith.constant dense<0.000000e+00> : vector<8x128xf32>
    %119 = tpu.matmul %116, %118, %cst_65 {dimension_numbers = #tpu.dot_dimension_numbers<[1], [0], [0], [1], [0, 0, 1, 1], [], []>} : vector<8x128xbf16>, vector<128x128xbf16>, vector<8x128xf32> -> vector<8x128xf32>
    %c0_66 = arith.constant 0 : index
    %c0_67 = arith.constant 0 : index
    %c0_68 = arith.constant 0 : index
    %120 = vector.load %arg14[%c0_66, %c0_67, %c0_68] : memref<2x1x128xf32, #tpu.memory_space<vmem>>, vector<1x1x128xf32>
    %121 = vector.shape_cast %120 : vector<1x1x128xf32> to vector<1x128xf32>
    %122 = vector.broadcast %121 : vector<1x128xf32> to vector<8x128xf32>
    %123 = arith.addf %119, %122 : vector<8x128xf32>
    %124 = arith.addf %78, %123 : vector<8x128xf32>
    %c0_69 = arith.constant 0 : index
    %c0_70 = arith.constant 0 : index
    %c0_71 = arith.constant 0 : index
    %125 = vector.load %arg17[%c0_69, %c0_70, %c0_71] : memref<2x1x128xf32, #tpu.memory_space<vmem>>, vector<1x1x128xf32>
    %126 = vector.shape_cast %125 : vector<1x1x128xf32> to vector<1x128xf32>
    %c0_72 = arith.constant 0 : index
    %c0_73 = arith.constant 0 : index
    %c0_74 = arith.constant 0 : index
    %127 = vector.load %arg18[%c0_72, %c0_73, %c0_74] : memref<2x1x128xf32, #tpu.memory_space<vmem>>, vector<1x1x128xf32>
    %128 = vector.shape_cast %127 : vector<1x1x128xf32> to vector<1x128xf32>
    %cst_75 = arith.constant dense<0.000000e+00> : vector<8xf32>
    %129 = vector.multi_reduction <add>, %124, %cst_75 [1] : vector<8x128xf32> to vector<8xf32>
    %130 = vector.shape_cast %129 : vector<8xf32> to vector<8x1xf32>
    %cst_76 = arith.constant 3.125000e-02 : f32
    %131 = vector.broadcast %cst_76 : f32 to vector<8x1xf32>
    %132 = arith.mulf %130, %131 : vector<8x1xf32>
    %133 = vector.broadcast %132 : vector<8x1xf32> to vector<8x128xf32>
    %134 = arith.subf %124, %133 : vector<8x128xf32>
    %135 = vector.broadcast %4 : vector<1x128xf32> to vector<8x128xf32>
    %136 = arith.mulf %134, %135 : vector<8x128xf32>
    %137 = arith.mulf %136, %136 : vector<8x128xf32>
    %cst_77 = arith.constant dense<0.000000e+00> : vector<8xf32>
    %138 = vector.multi_reduction <add>, %137, %cst_77 [1] : vector<8x128xf32> to vector<8xf32>
    %139 = vector.shape_cast %138 : vector<8xf32> to vector<8x1xf32>
    %cst_78 = arith.constant 3.125000e-02 : f32
    %140 = vector.broadcast %cst_78 : f32 to vector<8x1xf32>
    %141 = arith.mulf %139, %140 : vector<8x1xf32>
    %cst_79 = arith.constant 9.99999974E-6 : f32
    %142 = vector.broadcast %cst_79 : f32 to vector<8x1xf32>
    %143 = arith.addf %141, %142 : vector<8x1xf32>
    %144 = math.rsqrt %143 : vector<8x1xf32>
    %145 = vector.broadcast %144 : vector<8x1xf32> to vector<8x128xf32>
    %146 = arith.mulf %136, %145 : vector<8x128xf32>
    %147 = vector.broadcast %126 : vector<1x128xf32> to vector<8x128xf32>
    %148 = arith.mulf %146, %147 : vector<8x128xf32>
    %149 = vector.broadcast %128 : vector<1x128xf32> to vector<8x128xf32>
    %150 = arith.addf %148, %149 : vector<8x128xf32>
    %151 = vector.broadcast %10 : vector<8x1xf32> to vector<8x128xf32>
    %152 = arith.mulf %150, %151 : vector<8x128xf32>
    %c1_i32_80 = arith.constant 1 : i32
    %153 = tpu.dynamic_rotate %152 by %c1_i32_80 dim 0 : vector<8x128xf32>, i32 -> vector<8x128xf32>
    %cst_81 = arith.constant 0.000000e+00 : f32
    %154 = vector.shape_cast %7 : vector<8x1xi1> to vector<8x1xi1>
    %155 = vector.broadcast %154 : vector<8x1xi1> to vector<8x128xi1>
    %156 = vector.broadcast %cst_81 : f32 to vector<8x128xf32>
    %157 = arith.select %155, %153, %156 : vector<8x128xi1>, vector<8x128xf32>
    %c7_i32_82 = arith.constant 7 : i32
    %158 = tpu.dynamic_rotate %152 by %c7_i32_82 dim 0 : vector<8x128xf32>, i32 -> vector<8x128xf32>
    %cst_83 = arith.constant 0.000000e+00 : f32
    %159 = vector.shape_cast %9 : vector<8x1xi1> to vector<8x1xi1>
    %160 = vector.broadcast %159 : vector<8x1xi1> to vector<8x128xi1>
    %161 = vector.broadcast %cst_83 : f32 to vector<8x128xf32>
    %162 = arith.select %160, %158, %161 : vector<8x128xi1>, vector<8x128xf32>
    %163 = arith.truncf %157 : vector<8x128xf32> to vector<8x128xbf16>
    %c1_84 = arith.constant 1 : index
    %c0_85 = arith.constant 0 : index
    %c0_86 = arith.constant 0 : index
    %c0_87 = arith.constant 0 : index
    %164 = vector.load %arg7[%c1_84, %c0_85, %c0_86, %c0_87] : memref<2x3x128x128xbf16, #tpu.memory_space<vmem>>, vector<1x1x128x128xbf16>
    %165 = vector.shape_cast %164 : vector<1x1x128x128xbf16> to vector<128x128xbf16>
    %cst_88 = arith.constant dense<0.000000e+00> : vector<8x128xf32>
    %166 = tpu.matmul %163, %165, %cst_88 {dimension_numbers = #tpu.dot_dimension_numbers<[1], [0], [0], [1], [0, 0, 1, 1], [], []>} : vector<8x128xbf16>, vector<128x128xbf16>, vector<8x128xf32> -> vector<8x128xf32>
    %167 = arith.truncf %152 : vector<8x128xf32> to vector<8x128xbf16>
    %c1_89 = arith.constant 1 : index
    %c1_90 = arith.constant 1 : index
    %c0_91 = arith.constant 0 : index
    %c0_92 = arith.constant 0 : index
    %168 = vector.load %arg7[%c1_89, %c1_90, %c0_91, %c0_92] : memref<2x3x128x128xbf16, #tpu.memory_space<vmem>>, vector<1x1x128x128xbf16>
    %169 = vector.shape_cast %168 : vector<1x1x128x128xbf16> to vector<128x128xbf16>
    %cst_93 = arith.constant dense<0.000000e+00> : vector<8x128xf32>
    %170 = tpu.matmul %167, %169, %cst_93 {dimension_numbers = #tpu.dot_dimension_numbers<[1], [0], [0], [1], [0, 0, 1, 1], [], []>} : vector<8x128xbf16>, vector<128x128xbf16>, vector<8x128xf32> -> vector<8x128xf32>
    %171 = arith.addf %166, %170 : vector<8x128xf32>
    %172 = arith.truncf %162 : vector<8x128xf32> to vector<8x128xbf16>
    %c1_94 = arith.constant 1 : index
    %c2_95 = arith.constant 2 : index
    %c0_96 = arith.constant 0 : index
    %c0_97 = arith.constant 0 : index
    %173 = vector.load %arg7[%c1_94, %c2_95, %c0_96, %c0_97] : memref<2x3x128x128xbf16, #tpu.memory_space<vmem>>, vector<1x1x128x128xbf16>
    %174 = vector.shape_cast %173 : vector<1x1x128x128xbf16> to vector<128x128xbf16>
    %cst_98 = arith.constant dense<0.000000e+00> : vector<8x128xf32>
    %175 = tpu.matmul %172, %174, %cst_98 {dimension_numbers = #tpu.dot_dimension_numbers<[1], [0], [0], [1], [0, 0, 1, 1], [], []>} : vector<8x128xbf16>, vector<128x128xbf16>, vector<8x128xf32> -> vector<8x128xf32>
    %176 = arith.addf %171, %175 : vector<8x128xf32>
    %c1_99 = arith.constant 1 : index
    %c0_100 = arith.constant 0 : index
    %c0_101 = arith.constant 0 : index
    %177 = vector.load %arg8[%c1_99, %c0_100, %c0_101] : memref<2x1x128xf32, #tpu.memory_space<vmem>>, vector<1x1x128xf32>
    %178 = vector.shape_cast %177 : vector<1x1x128xf32> to vector<1x128xf32>
    %179 = vector.broadcast %178 : vector<1x128xf32> to vector<8x128xf32>
    %180 = arith.addf %176, %179 : vector<8x128xf32>
    %cst_102 = arith.constant 0.000000e+00 : f32
    %181 = vector.broadcast %cst_102 : f32 to vector<8x128xf32>
    %182 = arith.maximumf %180, %181 : vector<8x128xf32>
    %183 = arith.addf %150, %182 : vector<8x128xf32>
    %c1_103 = arith.constant 1 : index
    %c0_104 = arith.constant 0 : index
    %c0_105 = arith.constant 0 : index
    %184 = vector.load %arg15[%c1_103, %c0_104, %c0_105] : memref<2x1x128xf32, #tpu.memory_space<vmem>>, vector<1x1x128xf32>
    %185 = vector.shape_cast %184 : vector<1x1x128xf32> to vector<1x128xf32>
    %c1_106 = arith.constant 1 : index
    %c0_107 = arith.constant 0 : index
    %c0_108 = arith.constant 0 : index
    %186 = vector.load %arg16[%c1_106, %c0_107, %c0_108] : memref<2x1x128xf32, #tpu.memory_space<vmem>>, vector<1x1x128xf32>
    %187 = vector.shape_cast %186 : vector<1x1x128xf32> to vector<1x128xf32>
    %cst_109 = arith.constant dense<0.000000e+00> : vector<8xf32>
    %188 = vector.multi_reduction <add>, %183, %cst_109 [1] : vector<8x128xf32> to vector<8xf32>
    %189 = vector.shape_cast %188 : vector<8xf32> to vector<8x1xf32>
    %cst_110 = arith.constant 3.125000e-02 : f32
    %190 = vector.broadcast %cst_110 : f32 to vector<8x1xf32>
    %191 = arith.mulf %189, %190 : vector<8x1xf32>
    %192 = vector.broadcast %191 : vector<8x1xf32> to vector<8x128xf32>
    %193 = arith.subf %183, %192 : vector<8x128xf32>
    %194 = vector.broadcast %4 : vector<1x128xf32> to vector<8x128xf32>
    %195 = arith.mulf %193, %194 : vector<8x128xf32>
    %196 = arith.mulf %195, %195 : vector<8x128xf32>
    %cst_111 = arith.constant dense<0.000000e+00> : vector<8xf32>
    %197 = vector.multi_reduction <add>, %196, %cst_111 [1] : vector<8x128xf32> to vector<8xf32>
    %198 = vector.shape_cast %197 : vector<8xf32> to vector<8x1xf32>
    %cst_112 = arith.constant 3.125000e-02 : f32
    %199 = vector.broadcast %cst_112 : f32 to vector<8x1xf32>
    %200 = arith.mulf %198, %199 : vector<8x1xf32>
    %cst_113 = arith.constant 9.99999974E-6 : f32
    %201 = vector.broadcast %cst_113 : f32 to vector<8x1xf32>
    %202 = arith.addf %200, %201 : vector<8x1xf32>
    %203 = math.rsqrt %202 : vector<8x1xf32>
    %204 = vector.broadcast %203 : vector<8x1xf32> to vector<8x128xf32>
    %205 = arith.mulf %195, %204 : vector<8x128xf32>
    %206 = vector.broadcast %185 : vector<1x128xf32> to vector<8x128xf32>
    %207 = arith.mulf %205, %206 : vector<8x128xf32>
    %208 = vector.broadcast %187 : vector<1x128xf32> to vector<8x128xf32>
    %209 = arith.addf %207, %208 : vector<8x128xf32>
    %210 = arith.truncf %209 : vector<8x128xf32> to vector<8x128xbf16>
    %c1_114 = arith.constant 1 : index
    %c0_115 = arith.constant 0 : index
    %c0_116 = arith.constant 0 : index
    %211 = vector.load %arg9[%c1_114, %c0_115, %c0_116] : memref<2x128x128xbf16, #tpu.memory_space<vmem>>, vector<1x128x128xbf16>
    %212 = vector.shape_cast %211 : vector<1x128x128xbf16> to vector<128x128xbf16>
    %cst_117 = arith.constant dense<0.000000e+00> : vector<8x128xf32>
    %213 = tpu.matmul %210, %212, %cst_117 {dimension_numbers = #tpu.dot_dimension_numbers<[1], [0], [0], [1], [0, 0, 1, 1], [], []>} : vector<8x128xbf16>, vector<128x128xbf16>, vector<8x128xf32> -> vector<8x128xf32>
    %c1_118 = arith.constant 1 : index
    %c0_119 = arith.constant 0 : index
    %c0_120 = arith.constant 0 : index
    %214 = vector.load %arg10[%c1_118, %c0_119, %c0_120] : memref<2x1x128xf32, #tpu.memory_space<vmem>>, vector<1x1x128xf32>
    %215 = vector.shape_cast %214 : vector<1x1x128xf32> to vector<1x128xf32>
    %216 = vector.broadcast %215 : vector<1x128xf32> to vector<8x128xf32>
    %217 = arith.addf %213, %216 : vector<8x128xf32>
    %cst_121 = arith.constant 0.176776692 : f32
    %218 = vector.broadcast %cst_121 : f32 to vector<8x128xf32>
    %219 = arith.mulf %217, %218 : vector<8x128xf32>
    %c1_122 = arith.constant 1 : index
    %c0_123 = arith.constant 0 : index
    %c0_124 = arith.constant 0 : index
    %220 = vector.load %arg11[%c1_122, %c0_123, %c0_124] : memref<2x128x256xbf16, #tpu.memory_space<vmem>>, vector<1x128x256xbf16>
    %221 = vector.shape_cast %220 : vector<1x128x256xbf16> to vector<128x256xbf16>
    %cst_125 = arith.constant dense<0.000000e+00> : vector<128x256xf32>
    %222 = tpu.matmul %11, %221, %cst_125 {dimension_numbers = #tpu.dot_dimension_numbers<[1], [0], [0], [1], [0, 0, 1, 1], [], []>} : vector<128x128xbf16>, vector<128x256xbf16>, vector<128x256xf32> -> vector<128x256xf32>
    %c1_126 = arith.constant 1 : index
    %c0_127 = arith.constant 0 : index
    %c0_128 = arith.constant 0 : index
    %223 = vector.load %arg12[%c1_126, %c0_127, %c0_128] : memref<2x1x256xf32, #tpu.memory_space<vmem>>, vector<1x1x256xf32>
    %224 = vector.shape_cast %223 : vector<1x1x256xf32> to vector<1x256xf32>
    %225 = vector.broadcast %224 : vector<1x256xf32> to vector<128x256xf32>
    %226 = arith.addf %222, %225 : vector<128x256xf32>
    %227 = arith.truncf %219 : vector<8x128xf32> to vector<8x128xbf16>
    %228 = vector.extract_strided_slice %226 {offsets = [0, 0], sizes = [128, 128], strides = [1, 1]} : vector<128x256xf32> to vector<128x128xf32>
    %229 = arith.truncf %228 : vector<128x128xf32> to vector<128x128xbf16>
    %230 = vector.extract_strided_slice %226 {offsets = [0, 128], sizes = [128, 128], strides = [1, 1]} : vector<128x256xf32> to vector<128x128xf32>
    %231 = arith.truncf %230 : vector<128x128xf32> to vector<128x128xbf16>
    %cst_129 = arith.constant dense<0.000000e+00> : vector<8x128xf32>
    %232 = tpu.matmul %227, %229, %cst_129 {dimension_numbers = #tpu.dot_dimension_numbers<[1], [1], [0], [0], [0, 0, 1, 0], [], []>} : vector<8x128xbf16>, vector<128x128xbf16>, vector<8x128xf32> -> vector<8x128xf32>
    %233 = vector.broadcast %13 : vector<1x128xf32> to vector<8x128xf32>
    %234 = arith.addf %232, %233 : vector<8x128xf32>
    %cst_130 = arith.constant dense<0xFF800000> : vector<8xf32>
    %235 = vector.multi_reduction <maximumf>, %234, %cst_130 [1] : vector<8x128xf32> to vector<8xf32>
    %236 = vector.shape_cast %235 : vector<8xf32> to vector<8x1xf32>
    %237 = vector.broadcast %236 : vector<8x1xf32> to vector<8x128xf32>
    %238 = arith.subf %234, %237 : vector<8x128xf32>
    %239 = math.exp %238 : vector<8x128xf32>
    %cst_131 = arith.constant dense<0.000000e+00> : vector<8xf32>
    %240 = vector.multi_reduction <add>, %239, %cst_131 [1] : vector<8x128xf32> to vector<8xf32>
    %241 = vector.shape_cast %240 : vector<8xf32> to vector<8x1xf32>
    %242 = arith.truncf %239 : vector<8x128xf32> to vector<8x128xbf16>
    %cst_132 = arith.constant dense<0.000000e+00> : vector<8x128xf32>
    %243 = tpu.matmul %242, %231, %cst_132 {dimension_numbers = #tpu.dot_dimension_numbers<[1], [0], [0], [1], [0, 0, 1, 1], [], []>} : vector<8x128xbf16>, vector<128x128xbf16>, vector<8x128xf32> -> vector<8x128xf32>
    %244 = tpu.reciprocal %241 {approx = true} : vector<8x1xf32> -> vector<8x1xf32>
    %245 = vector.broadcast %244 : vector<8x1xf32> to vector<8x128xf32>
    %246 = arith.mulf %243, %245 : vector<8x128xf32>
    %247 = arith.truncf %246 : vector<8x128xf32> to vector<8x128xbf16>
    %c1_133 = arith.constant 1 : index
    %c0_134 = arith.constant 0 : index
    %c0_135 = arith.constant 0 : index
    %248 = vector.load %arg13[%c1_133, %c0_134, %c0_135] : memref<2x128x128xbf16, #tpu.memory_space<vmem>>, vector<1x128x128xbf16>
    %249 = vector.shape_cast %248 : vector<1x128x128xbf16> to vector<128x128xbf16>
    %cst_136 = arith.constant dense<0.000000e+00> : vector<8x128xf32>
    %250 = tpu.matmul %247, %249, %cst_136 {dimension_numbers = #tpu.dot_dimension_numbers<[1], [0], [0], [1], [0, 0, 1, 1], [], []>} : vector<8x128xbf16>, vector<128x128xbf16>, vector<8x128xf32> -> vector<8x128xf32>
    %c1_137 = arith.constant 1 : index
    %c0_138 = arith.constant 0 : index
    %c0_139 = arith.constant 0 : index
    %251 = vector.load %arg14[%c1_137, %c0_138, %c0_139] : memref<2x1x128xf32, #tpu.memory_space<vmem>>, vector<1x1x128xf32>
    %252 = vector.shape_cast %251 : vector<1x1x128xf32> to vector<1x128xf32>
    %253 = vector.broadcast %252 : vector<1x128xf32> to vector<8x128xf32>
    %254 = arith.addf %250, %253 : vector<8x128xf32>
    %255 = arith.addf %209, %254 : vector<8x128xf32>
    %c1_140 = arith.constant 1 : index
    %c0_141 = arith.constant 0 : index
    %c0_142 = arith.constant 0 : index
    %256 = vector.load %arg17[%c1_140, %c0_141, %c0_142] : memref<2x1x128xf32, #tpu.memory_space<vmem>>, vector<1x1x128xf32>
    %257 = vector.shape_cast %256 : vector<1x1x128xf32> to vector<1x128xf32>
    %c1_143 = arith.constant 1 : index
    %c0_144 = arith.constant 0 : index
    %c0_145 = arith.constant 0 : index
    %258 = vector.load %arg18[%c1_143, %c0_144, %c0_145] : memref<2x1x128xf32, #tpu.memory_space<vmem>>, vector<1x1x128xf32>
    %259 = vector.shape_cast %258 : vector<1x1x128xf32> to vector<1x128xf32>
    %cst_146 = arith.constant dense<0.000000e+00> : vector<8xf32>
    %260 = vector.multi_reduction <add>, %255, %cst_146 [1] : vector<8x128xf32> to vector<8xf32>
    %261 = vector.shape_cast %260 : vector<8xf32> to vector<8x1xf32>
    %cst_147 = arith.constant 3.125000e-02 : f32
    %262 = vector.broadcast %cst_147 : f32 to vector<8x1xf32>
    %263 = arith.mulf %261, %262 : vector<8x1xf32>
    %264 = vector.broadcast %263 : vector<8x1xf32> to vector<8x128xf32>
    %265 = arith.subf %255, %264 : vector<8x128xf32>
    %266 = vector.broadcast %4 : vector<1x128xf32> to vector<8x128xf32>
    %267 = arith.mulf %265, %266 : vector<8x128xf32>
    %268 = arith.mulf %267, %267 : vector<8x128xf32>
    %cst_148 = arith.constant dense<0.000000e+00> : vector<8xf32>
    %269 = vector.multi_reduction <add>, %268, %cst_148 [1] : vector<8x128xf32> to vector<8xf32>
    %270 = vector.shape_cast %269 : vector<8xf32> to vector<8x1xf32>
    %cst_149 = arith.constant 3.125000e-02 : f32
    %271 = vector.broadcast %cst_149 : f32 to vector<8x1xf32>
    %272 = arith.mulf %270, %271 : vector<8x1xf32>
    %cst_150 = arith.constant 9.99999974E-6 : f32
    %273 = vector.broadcast %cst_150 : f32 to vector<8x1xf32>
    %274 = arith.addf %272, %273 : vector<8x1xf32>
    %275 = math.rsqrt %274 : vector<8x1xf32>
    %276 = vector.broadcast %275 : vector<8x1xf32> to vector<8x128xf32>
    %277 = arith.mulf %267, %276 : vector<8x128xf32>
    %278 = vector.broadcast %257 : vector<1x128xf32> to vector<8x128xf32>
    %279 = arith.mulf %277, %278 : vector<8x128xf32>
    %280 = vector.broadcast %259 : vector<1x128xf32> to vector<8x128xf32>
    %281 = arith.addf %279, %280 : vector<8x128xf32>
    %282 = arith.truncf %281 : vector<8x128xf32> to vector<8x128xbf16>
    %c0_151 = arith.constant 0 : index
    %c0_152 = arith.constant 0 : index
    %283 = vector.load %arg19[%c0_151, %c0_152] : memref<128x128xbf16, #tpu.memory_space<vmem>>, vector<128x128xbf16>
    %cst_153 = arith.constant dense<0.000000e+00> : vector<8x128xf32>
    %284 = tpu.matmul %282, %283, %cst_153 {dimension_numbers = #tpu.dot_dimension_numbers<[1], [0], [0], [1], [0, 0, 1, 1], [], []>} : vector<8x128xbf16>, vector<128x128xbf16>, vector<8x128xf32> -> vector<8x128xf32>
    %c0_154 = arith.constant 0 : index
    %c0_155 = arith.constant 0 : index
    %285 = vector.load %arg20[%c0_154, %c0_155] : memref<1x128xf32, #tpu.memory_space<vmem>>, vector<1x128xf32>
    %286 = vector.broadcast %285 : vector<1x128xf32> to vector<8x128xf32>
    %287 = arith.addf %284, %286 : vector<8x128xf32>
    %288 = vector.broadcast %10 : vector<8x1xf32> to vector<8x128xf32>
    %289 = arith.mulf %287, %288 : vector<8x128xf32>
    %c0_156 = arith.constant 0 : index
    %c0_157 = arith.constant 0 : index
    %290 = vector.load %arg21[%c0_156, %c0_157] : memref<8x128xf32, #tpu.memory_space<vmem>>, vector<8x128xf32>
    tpu.vector_store %arg21[%c0_156, %c0_157], %289 {strides = array<i32>} : memref<8x128xf32, #tpu.memory_space<vmem>>, vector<8x128xf32>,
    return
  }
  func.func @transform_0(%arg0: i32) -> (i32, i32) {
    %c0_i32 = arith.constant 0 : i32
    %c0_i32_0 = arith.constant 0 : i32
    return %arg0, %c0_i32 : i32, i32
  }
  func.func @transform_1(%arg0: i32) -> (i32, i32) {
    %c0_i32 = arith.constant 0 : i32
    %c0_i32_0 = arith.constant 0 : i32
    return %arg0, %c0_i32 : i32, i32
  }
  func.func @transform_2(%arg0: i32) -> (i32, i32) {
    %c0_i32 = arith.constant 0 : i32
    %c0_i32_0 = arith.constant 0 : i32
    return %arg0, %c0_i32 : i32, i32
  }
  func.func @transform_3(%arg0: i32) -> (i32, i32, i32) {
    %c0_i32 = arith.constant 0 : i32
    %c0_i32_0 = arith.constant 0 : i32
    %c0_i32_1 = arith.constant 0 : i32
    return %arg0, %c0_i32, %c0_i32_0 : i32, i32, i32
  }
  func.func @transform_4(%arg0: i32) -> (i32, i32) {
    %c0_i32 = arith.constant 0 : i32
    %c0_i32_0 = arith.constant 0 : i32
    %c0_i32_1 = arith.constant 0 : i32
    return %c0_i32, %c0_i32_0 : i32, i32
  }
  func.func @transform_5(%arg0: i32) -> (i32, i32) {
    %c0_i32 = arith.constant 0 : i32
    %c0_i32_0 = arith.constant 0 : i32
    %c0_i32_1 = arith.constant 0 : i32
    return %c0_i32, %c0_i32_0 : i32, i32
  }
  func.func @transform_6(%arg0: i32) -> (i32, i32, i32, i32) {
    %c0_i32 = arith.constant 0 : i32
    %c0_i32_0 = arith.constant 0 : i32
    %c0_i32_1 = arith.constant 0 : i32
    %c0_i32_2 = arith.constant 0 : i32
    %c0_i32_3 = arith.constant 0 : i32
    return %c0_i32, %c0_i32_0, %c0_i32_1, %c0_i32_2 : i32, i32, i32, i32
  }
  func.func @transform_7(%arg0: i32) -> (i32, i32, i32) {
    %c0_i32 = arith.constant 0 : i32
    %c0_i32_0 = arith.constant 0 : i32
    %c0_i32_1 = arith.constant 0 : i32
    %c0_i32_2 = arith.constant 0 : i32
    return %c0_i32, %c0_i32_0, %c0_i32_1 : i32, i32, i32
  }
  func.func @transform_8(%arg0: i32) -> (i32, i32, i32) {
    %c0_i32 = arith.constant 0 : i32
    %c0_i32_0 = arith.constant 0 : i32
    %c0_i32_1 = arith.constant 0 : i32
    %c0_i32_2 = arith.constant 0 : i32
    return %c0_i32, %c0_i32_0, %c0_i32_1 : i32, i32, i32
  }
  func.func @transform_9(%arg0: i32) -> (i32, i32, i32) {
    %c0_i32 = arith.constant 0 : i32
    %c0_i32_0 = arith.constant 0 : i32
    %c0_i32_1 = arith.constant 0 : i32
    %c0_i32_2 = arith.constant 0 : i32
    return %c0_i32, %c0_i32_0, %c0_i32_1 : i32, i32, i32
  }
  func.func @transform_10(%arg0: i32) -> (i32, i32, i32) {
    %c0_i32 = arith.constant 0 : i32
    %c0_i32_0 = arith.constant 0 : i32
    %c0_i32_1 = arith.constant 0 : i32
    %c0_i32_2 = arith.constant 0 : i32
    return %c0_i32, %c0_i32_0, %c0_i32_1 : i32, i32, i32
  }
  func.func @transform_11(%arg0: i32) -> (i32, i32, i32) {
    %c0_i32 = arith.constant 0 : i32
    %c0_i32_0 = arith.constant 0 : i32
    %c0_i32_1 = arith.constant 0 : i32
    %c0_i32_2 = arith.constant 0 : i32
    return %c0_i32, %c0_i32_0, %c0_i32_1 : i32, i32, i32
  }
  func.func @transform_12(%arg0: i32) -> (i32, i32, i32) {
    %c0_i32 = arith.constant 0 : i32
    %c0_i32_0 = arith.constant 0 : i32
    %c0_i32_1 = arith.constant 0 : i32
    %c0_i32_2 = arith.constant 0 : i32
    return %c0_i32, %c0_i32_0, %c0_i32_1 : i32, i32, i32
  }
  func.func @transform_13(%arg0: i32) -> (i32, i32, i32) {
    %c0_i32 = arith.constant 0 : i32
    %c0_i32_0 = arith.constant 0 : i32
    %c0_i32_1 = arith.constant 0 : i32
    %c0_i32_2 = arith.constant 0 : i32
    return %c0_i32, %c0_i32_0, %c0_i32_1 : i32, i32, i32
  }
  func.func @transform_14(%arg0: i32) -> (i32, i32, i32) {
    %c0_i32 = arith.constant 0 : i32
    %c0_i32_0 = arith.constant 0 : i32
    %c0_i32_1 = arith.constant 0 : i32
    %c0_i32_2 = arith.constant 0 : i32
    return %c0_i32, %c0_i32_0, %c0_i32_1 : i32, i32, i32
  }
  func.func @transform_15(%arg0: i32) -> (i32, i32, i32) {
    %c0_i32 = arith.constant 0 : i32
    %c0_i32_0 = arith.constant 0 : i32
    %c0_i32_1 = arith.constant 0 : i32
    %c0_i32_2 = arith.constant 0 : i32
    return %c0_i32, %c0_i32_0, %c0_i32_1 : i32, i32, i32
  }
  func.func @transform_16(%arg0: i32) -> (i32, i32, i32) {
    %c0_i32 = arith.constant 0 : i32
    %c0_i32_0 = arith.constant 0 : i32
    %c0_i32_1 = arith.constant 0 : i32
    %c0_i32_2 = arith.constant 0 : i32
    return %c0_i32, %c0_i32_0, %c0_i32_1 : i32, i32, i32
  }
  func.func @transform_17(%arg0: i32) -> (i32, i32, i32) {
    %c0_i32 = arith.constant 0 : i32
    %c0_i32_0 = arith.constant 0 : i32
    %c0_i32_1 = arith.constant 0 : i32
    %c0_i32_2 = arith.constant 0 : i32
    return %c0_i32, %c0_i32_0, %c0_i32_1 : i32, i32, i32
  }
  func.func @transform_18(%arg0: i32) -> (i32, i32) {
    %c0_i32 = arith.constant 0 : i32
    %c0_i32_0 = arith.constant 0 : i32
    %c0_i32_1 = arith.constant 0 : i32
    return %c0_i32, %c0_i32_0 : i32, i32
  }
  func.func @transform_19(%arg0: i32) -> (i32, i32) {
    %c0_i32 = arith.constant 0 : i32
    %c0_i32_0 = arith.constant 0 : i32
    %c0_i32_1 = arith.constant 0 : i32
    return %c0_i32, %c0_i32_0 : i32, i32
  }
  func.func @transform_20(%arg0: i32) -> (i32, i32) {
    %c0_i32 = arith.constant 0 : i32
    %c0_i32_0 = arith.constant 0 : i32
    return %arg0, %c0_i32 : i32, i32
  }
}

</mosaic_0001>

<bundles_post_ra>
// kernel: score_fn_forward.1
= control target key start
LH: loop header
LB: loop body
LE: loop exit
PB: predicated region body
PF: predicated region fallthrough
CT: control target
= control target key end

     0   :  { %s4440_s0 = inlined_call_operand.vmem [shape: bf16[16,128], index: 0, kind: input, shape index: {}]   ;;  %s4441_s1 = inlined_call_operand.vmem [shape: f32[16,1], index: 1, kind: input, shape index: {}]   ;;  %s4442_s2 = inlined_call_operand.vmem [shape: bf16[256,128], index: 2, kind: input, shape index: {}]   ;;  %s4443_s3 = inlined_call_operand.vmem [shape: f32[2,1,128], index: 3, kind: input, shape index: {}]   ;;  %s4444_s4 = inlined_call_operand.vmem [shape: bf16[128,128], index: 4, kind: input, shape index: {}]   ;;  %s4445_s5 = inlined_call_operand.vmem [shape: f32[1,128], index: 5, kind: input, shape index: {}]   ;;  %s4446_s6 = inlined_call_operand.vmem [shape: bf16[2,3,128,128], index: 6, kind: input, shape index: {}]   ;;  %s4447_s7 = inlined_call_operand.vmem [shape: f32[2,1,128], index: 7, kind: input, shape index: {}]   ;;  %s4448_s8 = inlined_call_operand.vmem [shape: bf16[2,128,128], index: 8, kind: input, shape index: {}]   ;;  %s4449_s9 = inlined_call_operand.vmem [shape: f32[2,1,128], index: 9, kind: input, shape index: {}]   ;;  %s4450_s10 = inlined_call_operand.vmem [shape: bf16[2,128,256], index: 10, kind: input, shape index: {}]   ;;  %s4451_s11 = inlined_call_operand.vmem [shape: f32[2,1,256], index: 11, kind: input, shape index: {}]   ;;  %s4452_s12 = inlined_call_operand.vmem [shape: bf16[2,128,128], index: 12, kind: input, shape index: {}]   ;;  %s4453_s13 = inlined_call_operand.vmem [shape: f32[2,1,128], index: 13, kind: input, shape index: {}]   ;;  %s4454_s14 = inlined_call_operand.vmem [shape: f32[2,1,128], index: 14, kind: input, shape index: {}]   ;;  %s4455_s15 = inlined_call_operand.vmem [shape: f32[2,1,128], index: 15, kind: input, shape index: {}]   ;;  %s4456_s16 = inlined_call_operand.vmem [shape: f32[2,1,128], index: 16, kind: input, shape index: {}]   ;;  %s4457_s17 = inlined_call_operand.vmem [shape: f32[2,1,128], index: 17, kind: input, shape index: {}]   ;;  %s4458_s18 = inlined_call_operand.vmem [shape: bf16[128,128], index: 18, kind: input, shape index: {}]   ;;  %s4459_s19 = inlined_call_operand.vmem [shape: f32[1,128], index: 19, kind: input, shape index: {}]   ;;  %s4460_s20 = inlined_call_operand.hbm [shape: f32[16,128], index: 20, kind: output, shape index: {}]  }
   0x1   :  { %4473 = sst [smem:[#allocation12_spill]] %s4440_s0 }
   0x2   :  { %4474 = sst [smem:[#allocation13_spill]] %s4441_s1 }
   0x3   :  { %4475 = sst [smem:[#allocation14_spill]] %s4442_s2 }
   0x4   :  { %4476 = sst [smem:[#allocation15_spill]] %s4443_s3 }
   0x5   :  { %4477 = sst [smem:[#allocation16_spill]] %s4444_s4 }
   0x6   :  { %4478 = sst [smem:[#allocation17_spill]] %s4445_s5 }
   0x7   :  { %4479 = sst [smem:[#allocation18_spill]] %s4459_s19 }
   0x8   :  { %4480 = sst [smem:[#allocation19_spill]] %s4460_s20 }
   0x9   :  { %25 = vsyncpa [#allocation3], 0 }
   0xa   :  { %27 = vsyncpa [#allocation3 + $0x1], 0  ;;  %s3601_s1 = smov 0   ;;  %s3603_s22 = smov 0  }
   0xb   :  { %s3605_s23 = smov 0   ;;  %s3607_s24 = smov 0  }
   0xc LB: > { %4481 = sst [smem:[#allocation5_spill]] %s3480_s1  ;;  %s3622_s2 = sadd.s32 4294967295, %s3492_s24   ;;  %s3492_s24 = sphi %s3607_s24, %s4506_s24   ;;  %s3488_s23 = sphi %s3605_s23, %s4508_s23   ;;  %s3484_s22 = sphi %s3603_s22, %s4510_s22   ;;  %s3480_s1 = sphi %s3601_s1, %s4509_s1  }
   0xd   : > { %4482 = sst [smem:[#allocation6_spill]] %s3488_s23  ;;  %s2511_s25 = sadd.s32 4294967294, %s3492_s24  }
   0xe   : > { %4483 = sst [smem:[#allocation7_spill]] %s3492_s24  ;;  %s3626_s3 = sadd.s32 1, %s3492_s24  }
   0xf   : > { %4484 = sst [smem:[#allocation8_spill]] %s3626_s3  ;;  %s480_s26 = sadd.s32 1, %s3488_s23 }
  0x10   : > { %s477_s27 = ssub.s32 %s3492_s24, %s3626_s3  ;;  %p490_p0 = scmp.ne.s32.totalorder %s3488_s23, %s3484_s22 }
  0x11   : > { %p478_p1 = scmp.eq.s32.totalorder %s477_s27, 0  ;;  %p491_p2 = scmp.eq.s32.totalorder %s3622_s2, 1 }
  0x12   : > { %p496_p3 = scmp.ne.s32.totalorder %s3484_s22, %s3480_s1  ;;  %p497_p4 = scmp.eq.s32.totalorder %s2511_s25, 1 }
  0x13   : > { %s3637_s28 = scalar_select %p478_p1, %s3488_s23, %s480_s26  }
  0x14   : > { %p3639_p5 = por %p491_p2, %p490_p0  ;;  %p3643_p6 = por %p497_p4, %p496_p3 }
  0x15   : > { %4485 = sst [smem:[#allocation9_spill]] %s3637_s28  ;;  %p2514_p7 = scmp.ge.s32.totalorder %s3492_s24, 1 }
  0x16   : > { %s4486_s4 = scalar_select %p3639_p5, 1, 0 }
  0x17   : > { %s4488_s29 = scalar_select %p3643_p6, 1, 0 }
  0x18   : > { %4487 = sst [smem:[#allocation10_spill]] %s4486_s4  ;;  %p592_p8 = scmp.lt.s32.totalorder %s3492_s24, 3 }
  0x19   : > { %4489 = sst [smem:[#allocation11_spill]] %s4488_s29 }
  0x1a   : > { %p593_p9 = pnand %p2514_p7, %p592_p8 }
  0x1b   : > { %s4490_s21 = sld [smem:[#allocation16_spill]] (!%p593_p9)  ;;  %p661_p10 = scmp.lt.s32.totalorder (!%p593_p9), %s3622_s2, 1 }
  0x1c   : > { %596 = sbr.rel (%p593_p9) target bundleno = 3043 (0xbe3), region = 100  ;;  %s4491_s24 = sld [smem:[#allocation13_spill]] (!%p593_p9) }
  0x1d   : > { %s4492_s19 = sld [smem:[#allocation12_spill]] (!%p593_p9)  ;;  %s2518_s1 = sshll.u32 (!%p593_p9), %s3622_s2, 4 }
  0x1e   : > { %s4493_s5 = sld [smem:[#allocation17_spill]] (!%p593_p9)  ;;  %p670_p11 = scmp.lt.s32.totalorder (!%p593_p9), %s2518_s1, 31 }
  0x1f   : > { %s4499_s4 = sld [smem:[#allocation15_spill]] (!%p593_p9)  ;;  %s658_s26 = sand.u32 (!%p593_p9), 1, %s3484_s22  }
  0x20   : > { %s2515_s23 = sshll.u32 (!%p593_p9), %s658_s26, 3 }
  0x21   : > { %v3232_v0 = vld [vmem:[%s4490_s21 + $0x38] sm:$0xff]  ;;  %v3231_v1 = vld [vmem:[%s4490_s21 + $0x30] sm:$0xff]  ;;  %s3657_s27 = scalar_select %p661_p10, %s3622_s2, 1  ;;  %v3494_v2 = vmov 0   ;;  %v3230_v5 = vld [vmem:[%s4490_s21 + $0x28] sm:$0xff]  ;;  %v678_v40 = vlaneseq }
  0x22   : > { %774 = vmatpush.bf16.msra.mxu0 %v3232_v0  ;;  %3394 = vset.pattern.permute.xlu0 %v3494_v2  ;;  %v3240_v3 = vld [vmem:[%s4446_s6 + $0x38] sm:$0xff]  ;;  %v3239_v4 = vld [vmem:[%s4446_s6 + $0x30] sm:$0xff]  ;;  %v3238_v7 = vld [vmem:[%s4446_s6 + $0x28] sm:$0xff]  ;;  %s4512_s1 = smov (!%p670_p11, %s2518_s1), 31 }
  0x23   : > { %s2517_s3 = sshll.u32 %s3657_s27, 3  ;;  %945 = vmatpush.bf16.msra.mxu3 %v3240_v3  ;;  %v3229_v8 = vld [vmem:[%s4490_s21 + $0x20] sm:$0xff]  ;;  %v3228_v10 = vld [vmem:[%s4490_s21 + $0x18] sm:$0xff]  ;;  %v3227_v12 = vld [vmem:[%s4490_s21 + $0x10] sm:$0xff]  ;;  %s2516_s28 = sshll.u32 %s3657_s27, 2  ;;  %v684_v45 = vshrl.u32 %v678_v40, 7 }
  0x24   : > { %s668_s25 = scalar_lea.vmem %s4491_s24, %s2517_s3  ;;  %v3237_v9 = vld [vmem:[%s4446_s6 + $0x20] sm:$0xff]  ;;  %v3236_v11 = vld [vmem:[%s4446_s6 + $0x18] sm:$0xff]  ;;  %v3235_v13 = vld [vmem:[%s4446_s6 + $0x10] sm:$0xff]  ;;  %s664_s30 = scalar_lea.vmem %s4492_s19, %s2516_s28 }
  0x25   : > { %v687_v6 = vld [vmem:[%s668_s25] sm:$0xff]  ;;  %v3226_v14 = vld [vmem:[%s4490_s21 + $0x8] sm:$0xff]  ;;  %v3248_v17 = vld [vmem:[%s4446_s6 + $0x78] sm:$0xff]  ;;  %vm685_vm0 = vcmp.ne.s32.totalorder %v684_v45, 0  ;;  %s2519_s24 = sshll.u32 %s4512_s1, 2  ;;  %vm686_vm2 = vcmp.ne.s32.totalorder %v684_v45, 7 }
  0x26   : > { %775 = vmatpush.bf16.msra.mxu0 %v3231_v1  ;;  %789 = vperm.xlu0 %3394, %v687_v6   ;;  %v3234_v15 = vld [vmem:[%s4446_s6 + $0x8] sm:$0xff]  ;;  %v3225_v16 = vld [vmem:[%s4490_s21] sm:$0xff]  ;;  %v3256_v19 = vld [vmem:[%s4446_s6 + $0xb8] sm:$0xff]  ;;  %s4496_s28 = sld [smem:[#allocation14_spill]] }
  0x27   : > { %946 = vmatpush.bf16.msra.mxu3 %v3239_v4  ;;  %v3233_v18 = vld [vmem:[%s4446_s6] sm:$0xff]  ;;  %v3247_v21 = vld [vmem:[%s4446_s6 + $0x70] sm:$0xff]  ;;  %v3246_v23 = vld [vmem:[%s4446_s6 + $0x68] sm:$0xff]  ;;  %s4501_s19 = sld [smem:[#allocation19_spill]] }
  0x28   : > { %v705_v20 = vld [vmem:[%s664_s30] sm:$0xf]  ;;  %v3255_v22 = vld [vmem:[%s4446_s6 + $0xb0] sm:$0xff]  ;;  %v3244_v25 = vld [vmem:[%s4446_s6 + $0x58] sm:$0xff] }
  0x29   : > { %v3245_v24 = vld [vmem:[%s4446_s6 + $0x60] sm:$0xff]  ;;  %v3243_v26 = vld [vmem:[%s4446_s6 + $0x50] sm:$0xff]  ;;  %v3242_v27 = vld [vmem:[%s4446_s6 + $0x48] sm:$0xff] }
  0x2a   : > { %776 = vmatpush.bf16.msra.mxu0 %v3230_v5  ;;  %v3254_v28 = vld [vmem:[%s4446_s6 + $0xa8] sm:$0xff]  ;;  %v3241_v29 = vld [vmem:[%s4446_s6 + $0x40] sm:$0xff]  ;;  %v3252_v31 = vld [vmem:[%s4446_s6 + $0x98] sm:$0xff] }
  0x2b   : > { %947 = vmatpush.bf16.msra.mxu3 %v3238_v7  ;;  %v3253_v30 = vld [vmem:[%s4446_s6 + $0xa0] sm:$0xff]  ;;  %v3251_v32 = vld [vmem:[%s4446_s6 + $0x90] sm:$0xff]  ;;  %v3250_v33 = vld [vmem:[%s4446_s6 + $0x88] sm:$0xff] }
  0x2c   : > { %v3249_v34 = vld [vmem:[%s4446_s6 + $0x80] sm:$0xff]  ;;  %v2809_v35 = vld [vmem:[%s4450_s10 + $0x70] sm:$0xf]  ;;  %v3280_v36 = vld [vmem:[%s4450_s10 + $0x74] sm:$0xf0]  ;;  %s3825_s20 = scalar_lea.vmem %s4496_s28, %s2519_s24  ;;  %s677_s28 = scalar_lea.vmem %s4499_s4, %s3657_s27 }
  0x2d   : > { %v2801_v37 = vld [vmem:[%s4450_s10 + $0x60] sm:$0xf]  ;;  %v2810_v38 = vor.u32 %v3280_v36, %v2809_v35  ;;  %v3278_v39 = vld [vmem:[%s4450_s10 + $0x64] sm:$0xf0]  ;;  %v2793_v43 = vld [vmem:[%s4450_s10 + $0x50] sm:$0xf] }
  0x2e   : > { %777 = vmatpush.bf16.msra.mxu0 %v3229_v8  ;;  %v2802_v41 = vor.u32 %v3278_v39, %v2801_v37  ;;  %v3395_v42 = vld [vmem:[%s4493_s5] ss:$0 sm:$0xff]  ;;  %v3276_v44 = vld [vmem:[%s4450_s10 + $0x54] sm:$0xf0]  ;;  %v3274_v51 = vld [vmem:[%s4450_s10 + $0x44] sm:$0xf0] }
  0x2f   : > { %948 = vmatpush.bf16.msra.mxu3 %v3237_v9  ;;  %1309 = vmatpush.bf16.msra.mxu1 %v2810_v38  ;;  %v2794_v48 = vor.u32 %v3276_v44, %v2793_v43  ;;  %v2785_v50 = vld [vmem:[%s4450_s10 + $0x40] sm:$0xf]  ;;  %v2777_v56 = vld [vmem:[%s4450_s10 + $0x30] sm:$0xf]  ;;  %v3272_v57 = vld [vmem:[%s4450_s10 + $0x34] sm:$0xf0] }
  0x30   : > { %v2786_v53 = vor.u32 %v3274_v51, %v2785_v50  ;;  %vm3797_vm1 = vmpackc.low %vm685_vm0, %vm685_vm0  ;;  %v2778_v61 = vor.u32 %v3272_v57, %v2777_v56  ;;  %v2769_v62 = vld [vmem:[%s4450_s10 + $0x20] sm:$0xf]  ;;  %v3270_v63 = vld [vmem:[%s4450_s10 + $0x24] sm:$0xf0]  ;;  %v679_v50 = vand.u32 127, %v678_v40  ;;  %s3214_s24 = sshll.u32 %s3622_s2, 3 }
  0x31   : > { %v2770_v0 = vor.u32 %v3270_v63, %v2769_v62  ;;  %v2761_v1 = vld [vmem:[%s4450_s10 + $0x10] sm:$0xf]  ;;  %v3268_v2 = vld [vmem:[%s4450_s10 + $0x14] sm:$0xf0]  ;;  %v2753_v4 = vld [vmem:[%s4450_s10] sm:$0xf]  ;;  %s2414_s0 = scalar_lea.hbm %s4501_s19, %s3214_s24 }
  0x32   : > { %778 = vmatpush.bf16.msra.mxu0 %v3228_v10  ;;  %v2762_v3 = vor.u32 %v3268_v2, %v2761_v1  ;;  %v3266_v5 = vld [vmem:[%s4450_s10 + $0x4] sm:$0xf0]  ;;  %vm3827_vm3 = vmpackc.low %vm686_vm2, %vm686_vm2  ;;  %v3832_v10 = vld [vmem:[%s3825_s20] sm:$0xff]  ;;  %vm680_vm4 = vcmp.lt.s32.totalorder %v679_v50, 32  ;;  %s660_s4 = scalar_lea.vmem [#allocation2], %s2515_s23  ;;  %s2404_s2 = scalar_lea.sflag [#allocation3], %s658_s26 }
  0x33   : > { %949 = vmatpush.bf16.msra.mxu3 %v3236_v11  ;;  %1310 = vmatpush.bf16.msra.mxu1 %v2802_v41  ;;  %v2754_v7 = vor.u32 %v3266_v5, %v2753_v4  ;;  %v3838_v11 = vld [vmem:[%s3825_s20 + $0x8] sm:$0xff]  ;;  %v3884_v39 = vld [vmem:[%s4451_s11] sm:$0x3]  ;;  %v3279_v2 = vld [vmem:[%s4450_s10 + $0x74] sm:$0xf]  ;;  %s2416_s25 = sshll.u32 %s660_s4, 4  ;;  %s2417_s25 = int_to_ptr.vmem [resolvable:$true] %s2416_s25 }
  0x34   : > { %v3887_v41 = vperm.slane %v3884_v39, 0  ;;  %v3277_v4 = vld [vmem:[%s4450_s10 + $0x64] sm:$0xf]  ;;  %v3322_v58 = vld [vmem:[%s4450_s10 + $0x84] sm:$0xf0]  ;;  %s3450_s23 = scalar_lea.hbm %s4501_s19, 16 }
  0x35   : > { %v3265_v50 = vld [vmem:[%s4450_s10 + $0x4] sm:$0xf] }
  0x36   : > { %779 = vmatpush.bf16.msra.mxu0 %v3227_v12  ;;  %v3842_v12 = vld [vmem:[%s3825_s20 + $0x10] sm:$0xff] }
  0x37   : > { %950 = vmatpush.bf16.msra.mxu3 %v3235_v13  ;;  %1311 = vmatpush.bf16.msra.mxu1 %v2794_v48  ;;  %v3846_v13 = vld [vmem:[%s3825_s20 + $0x18] sm:$0xff] }
  0x3a   : > { %780 = vmatpush.bf16.msra.mxu0 %v3226_v14  ;;  %v3850_v14 = vld [vmem:[%s3825_s20 + $0x20] sm:$0xff] }
  0x3b   : > { %951 = vmatpush.bf16.msra.mxu3 %v3234_v15  ;;  %1312 = vmatpush.bf16.msra.mxu1 %v2786_v53  ;;  %v3854_v15 = vld [vmem:[%s3825_s20 + $0x28] sm:$0xff] }
  0x3e   : > { %781 = vmatpush.bf16.msra.mxu0 %v3225_v16 }
  0x3f   : > { %952 = vmatpush.bf16.msra.mxu3 %v3233_v18  ;;  %1313 = vmatpush.bf16.msra.mxu1 %v2778_v61 }
  0x41   : > { %782 = vmatmul.bf16.vlgmr.msra.gmra.mxu0 %v705_v20 }
  0x42   : > { %884 = vmatpush.bf16.msrb.mxu0 %v3248_v17  ;;  %v3858_v17 = vld [vmem:[%s3825_s20 + $0x30] sm:$0xff] }
  0x43   : > { %1024 = vmatpush.bf16.msrb.mxu3 %v3256_v19  ;;  %1314 = vmatpush.bf16.msra.mxu1 %v2770_v0 }
  0x46   : > { %885 = vmatpush.bf16.msrb.mxu0 %v3247_v21  ;;  %v3862_v21 = vld [vmem:[%s3825_s20 + $0x38] sm:$0xff] }
  0x47   : > { %1025 = vmatpush.bf16.msrb.mxu3 %v3255_v22  ;;  %1315 = vmatpush.bf16.msra.mxu1 %v2762_v3  ;;  %v2811_v3 = vld [vmem:[%s4450_s10 + $0x78] sm:$0xf0] }
  0x48   : > { %v2814_v5 = vor.u32 %v3279_v2, %v2811_v3 }
  0x4a   : > { %886 = vmatpush.bf16.msrb.mxu0 %v3246_v23  ;;  %v3396_v23 = vld [vmem:[%s4447_s7] ss:$0 sm:$0xff]  ;;  %1358 = vmatpush.bf16.msra.mxu2 %v2814_v5 }
  0x4b   : > { %1026 = vmatpush.bf16.msrb.mxu3 %v3254_v28  ;;  %1316 = vmatpush.bf16.msra.mxu1 %v2754_v7 }
  0x4e   : > { %887 = vmatpush.bf16.msrb.mxu0 %v3245_v24  ;;  %1317 = vmatmul.bf16.vlgmr.msra.gmra.mxu1 %v3832_v10 }
  0x4f   : > { %1027 = vmatpush.bf16.msrb.mxu3 %v3253_v30 }
  0x52   : > { %888 = vmatpush.bf16.msrb.mxu0 %v3244_v25 }
  0x53   : > { %1028 = vmatpush.bf16.msrb.mxu3 %v3252_v31 }
  0x56   : > { %889 = vmatpush.bf16.msrb.mxu0 %v3243_v26 }
  0x57   : > { %1029 = vmatpush.bf16.msrb.mxu3 %v3251_v32 }
  0x5a   : > { %890 = vmatpush.bf16.msrb.mxu0 %v3242_v27 }
  0x5b   : > { %1030 = vmatpush.bf16.msrb.mxu3 %v3250_v33 }
  0x5e   : > { %891 = vmatpush.bf16.msrb.mxu0 %v3241_v29  ;;  %1322 = vmatmul.bf16.gmra.mxu1 %v3838_v11 }
  0x5f   : > { %1031 = vmatpush.bf16.msrb.mxu3 %v3249_v34 }
  0x6e   : > { %1327 = vmatmul.bf16.gmra.mxu1 %v3842_v12 }
  0x7e   : > { %1332 = vmatmul.bf16.gmra.mxu1 %v3846_v13 }
  0x8e   : > { %1337 = vmatmul.bf16.gmra.mxu1 %v3850_v14 }
  0x98   : > { %v3779_v47 = vpop.permute.xlu0 %789 }
  0x9e   : > { %1342 = vmatmul.bf16.gmra.mxu1 %v3854_v15 }
  0xae   : > { %1347 = vmatmul.bf16.gmra.mxu1 %v3858_v17 }
  0xbe   : > { %v783_v46 = vpop.f32.mrf.mxu0  ;;  %1352 = vmatmul.bf16.gmra.mxu1 %v3862_v21 }
  0xbf   : > { %v3781_v49 = vadd.f32 %v3395_v42, %v783_v46 }
  0xc1   : > { %v792_v52 = vmul.f32 %v3779_v47, %v3781_v49 }
  0xc3   : > { %v818_v54 = vpack.c.bf16 %v792_v52, %v792_v52  ;;  %v793_v55 = vrot.slane %v792_v52, 7  ;;  %v797_v6 = vrot.slane %v792_v52, 1 }
  0xc5   : > { %892 = vmatmul.bf16.vlgmr.msrb.gmra.mxu0 %v818_v54  ;;  %v2634_v59 = vpack.c.bf16 %v793_v55, %v793_v55  ;;  %v2685_v9 = vpack.c.bf16 %v797_v6, %v797_v6  ;;  %v3495_v54 = vmov 0.0   ;;  %v2803_v6 = vld [vmem:[%s4450_s10 + $0x68] sm:$0xf0] }
  0xc6   : > { %v785_v60 = vpop.f32.mrf.mxu0  ;;  %v3892_v55 = vsel %vm680_vm4, 1.0, %v3495_v54  ;;  %v2806_v7 = vor.u32 %v3277_v4, %v2803_v6 }
  0xc7   : > { %2635 = vmatmul.msk.bf16.vlgmr.msra.gmra.mxu3 %vm3797_vm1, %v2634_v59 }
  0xc8   : > { %1359 = vmatpush.bf16.msra.mxu2 %v2806_v7 }
  0xcb   : > { %v3867_v24 = vpop.f32.mrf.mxu1 }
  0xd3   : > { %v3871_v31 = vpop.f32.mrf.mxu1 }
  0xd7   : > { %2686 = vmatmul.msk.bf16.vlgmr.msrb.gmra.mxu3 %vm3827_vm3, %v2685_v9 }
  0xdb   : > { %v3873_v32 = vpop.f32.mrf.mxu1 }
  0xe3   : > { %v3875_v33 = vpop.f32.mrf.mxu1 }
  0xeb   : > { %v3877_v34 = vpop.f32.mrf.mxu1 }
  0xf3   : > { %v3879_v35 = vpop.f32.mrf.mxu1 }
  0xf4   : > { %v1331_v54 = vadd.f32 %v3879_v35, %v3887_v41 }
  0xfb   : > { %v1333_v36 = vpop.f32.mrf.mxu1 }
 0x103   : > { %v1335_v37 = vpop.f32.mrf.mxu1 }
 0x10b   : > { %v1338_v38 = vpop.f32.mrf.mxu1 }
 0x10c   : > { %v1339_v42 = vadd.f32 %v1338_v38, %v3887_v41 }
 0x113   : > { %v1340_v43 = vpop.f32.mrf.mxu1 }
 0x114   : > { %v1341_v44 = vadd.f32 %v1340_v43, %v3887_v41 }
 0x116   : > { %v1412_v45 = vpack.c.bf16 %v1341_v44, %v1339_v42  ;;  %v2771_v42 = vld [vmem:[%s4450_s10 + $0x28] sm:$0xf0]  ;;  %v1334_v44 = vadd.f32 %v1333_v36, %v3887_v41 }
 0x117   : > { %v2755_v36 = vld [vmem:[%s4450_s10 + $0x8] sm:$0xf0] }
 0x11b   : > { %v1343_v46 = vpop.f32.mrf.mxu1 }
 0x123   : > { %v1345_v48 = vpop.f32.mrf.mxu1 }
 0x142   : > { %v893_v16 = vpop.f32.mrf.mxu0 }
 0x14a   : > { %v895_v18 = vpop.f32.mrf.mxu0  ;;  %v954_v19 = vpop.f32.mrf.mxu3 }
 0x14b   : > { %v955_v22 = vadd.f32 %v954_v19, %v893_v16  ;;  %v1344_v16 = vadd.f32 %v1343_v46, %v3887_v41  ;;  %v1346_v18 = vadd.f32 %v1345_v48, %v3887_v41  ;;  %v3275_v19 = vld [vmem:[%s4450_s10 + $0x54] sm:$0xf]  ;;  %v1336_v46 = vadd.f32 %v1335_v37, %v3887_v41  ;;  %v3264_v37 = vld [vmem:[%s4448_s8 + $0x38] sm:$0xff] }
 0x14c   : > { %v3267_v48 = vld [vmem:[%s4450_s10 + $0x14] sm:$0xf]  ;;  %1145 = vmatpush.bf16.msra.mxu0 %v3264_v37 }
 0x152   : > { %v956_v20 = vpop.f32.mrf.mxu3 }
 0x153   : > { %v2795_v20 = vld [vmem:[%s4450_s10 + $0x58] sm:$0xf0] }
 0x15a   : > { %v1033_v25 = vpop.f32.mrf.mxu3 }
 0x15b   : > { %v1037_v26 = vadd.f32 %v1033_v25, %v955_v22  ;;  %v3273_v22 = vld [vmem:[%s4450_s10 + $0x44] sm:$0xf]  ;;  %v2787_v25 = vld [vmem:[%s4450_s10 + $0x48] sm:$0xf0] }
 0x15d   : > { %v1042_v27 = vadd.f32 %v3396_v23, %v1037_v26  ;;  %v2798_v23 = vor.u32 %v3275_v19, %v2795_v20  ;;  %v2790_v26 = vor.u32 %v3273_v22, %v2787_v25  ;;  %v3398_v20 = vld [vmem:[%s4455_s15] ss:$0 sm:$0xff] }
 0x15f   : > { %v1043_v28 = vmax.f32 %v1042_v27, 0.0  ;;  %1360 = vmatpush.bf16.msra.mxu2 %v2798_v23  ;;  %v1413_v27 = vpack.c.bf16 %v1346_v18, %v1344_v16  ;;  %v3397_v16 = vld [vmem:[%s4454_s14] ss:$0 sm:$0xff] }
 0x161   : > { %v1044_v29 = vadd.f32 %v1043_v28, %v3781_v49  ;;  %v1348_v49 = vpop.f32.mrf.mxu1  ;;  %v3271_v28 = vld [vmem:[%s4450_s10 + $0x34] sm:$0xf] }
 0x162   : > { %v1035_v30 = vpop.f32.mrf.mxu3  ;;  %v1349_v0 = vadd.f32 %v1348_v49, %v3887_v41  ;;  %v2763_v49 = vld [vmem:[%s4450_s10 + $0x18] sm:$0xf0] }
 0x163   : > { %1047 = vadd.xlane.f32.xlu0 %v1044_v29  ;;  %1361 = vmatpush.bf16.msra.mxu2 %v2790_v26  ;;  %v3269_v30 = vld [vmem:[%s4450_s10 + $0x24] sm:$0xf] }
 0x164   : > { %v2774_v43 = vor.u32 %v3269_v30, %v2771_v42 }
 0x169   : > { %v1350_v51 = vpop.f32.mrf.mxu1 }
 0x16a   : > { %v1351_v1 = vadd.f32 %v1350_v51, %v3887_v41  ;;  %v2766_v51 = vor.u32 %v3267_v48, %v2763_v49 }
 0x16c   : > { %v1414_v9 = vpack.c.bf16 %v1351_v1, %v1349_v0 }
 0x171   : > { %v1353_v57 = vpop.f32.mrf.mxu1 }
 0x172   : > { %v1354_v61 = vadd.f32 %v1353_v57, %v3887_v41  ;;  %v1324_v57 = vadd.f32 %v3873_v32, %v3887_v41  ;;  %v3263_v32 = vld [vmem:[%s4448_s8 + $0x30] sm:$0xff] }
 0x173   : > { %1146 = vmatpush.bf16.msra.mxu0 %v3263_v32 }
 0x179   : > { %v1355_v62 = vpop.f32.mrf.mxu1 }
 0x17a   : > { %v1356_v40 = vadd.f32 %v1355_v62, %v3887_v41  ;;  %v1319_v62 = vadd.f32 %v3867_v24, %v3887_v41  ;;  %v3261_v24 = vld [vmem:[%s4448_s8 + $0x20] sm:$0xff] }
 0x17c   : > { %v1415_v63 = vpack.c.bf16 %v1356_v40, %v1354_v61  ;;  %v3258_v40 = vld [vmem:[%s4448_s8 + $0x8] sm:$0xff] }
 0x17e   : > { %1427 = vmatpush.bf16.xpose.msra.mxu3 %v1415_v63  ;;  %v3257_v63 = vld [vmem:[%s4448_s8] sm:$0xff] }
 0x186   : > { %1428 = vmatpush.bf16.xpose.msra.mxu3 %v1414_v9 }
 0x18e   : > { %1429 = vmatpush.bf16.xpose.msra.mxu3 %v1413_v27 }
 0x196   : > { %1430 = vmatpush.bf16.xpose.msra.mxu3 %v1412_v45  ;;  %v2758_v45 = vor.u32 %v3265_v50, %v2755_v36 }
 0x1d6   : > { %v1048_v52 = vpop.xlane.xlu0 %1047 }
 0x1d7   : > { %v1049_v53 = vmul.f32 0.03125, %v1048_v52  ;;  %v1411_v52 = vpack.c.bf16 %v1336_v46, %v1334_v44 }
 0x1d9   : > { %v1050_v56 = vsub.f32 %v1044_v29, %v1049_v53  ;;  %v2779_v29 = vld [vmem:[%s4450_s10 + $0x38] sm:$0xf0]  ;;  %v1329_v53 = vadd.f32 %v3877_v34, %v3887_v41  ;;  %1431 = vmatpush.bf16.xpose.msra.mxu3 %v1411_v52  ;;  %v1321_v34 = vadd.f32 %v3871_v31, %v3887_v41 }
 0x1da   : > { %v2782_v38 = vor.u32 %v3271_v28, %v2779_v29  ;;  %v3260_v31 = vld [vmem:[%s4448_s8 + $0x18] sm:$0xff] }
 0x1db   : > { %v3895_v59 = vmul.f32 %v3892_v55, %v1050_v56  ;;  %v1410_v56 = vpack.c.bf16 %v1331_v54, %v1329_v53  ;;  %v1408_v35 = vpack.c.bf16 %v1321_v34, %v1319_v62 }
 0x1dc   : > { %1362 = vmatpush.bf16.msra.mxu2 %v2782_v38 }
 0x1dd   : > { %v1052_v60 = vmul.f32 %v3895_v59, %v3895_v59 }
 0x1df   : > { %1053 = vadd.xlane.f32.xlu1 %v1052_v60  ;;  %v1326_v60 = vadd.f32 %v3875_v33, %v3887_v41  ;;  %v3262_v33 = vld [vmem:[%s4448_s8 + $0x28] sm:$0xff]  ;;  %v3259_v41 = vld [vmem:[%s4448_s8 + $0x10] sm:$0xff] }
 0x1e0   : > { %1363 = vmatpush.bf16.msra.mxu2 %v2774_v43  ;;  %1147 = vmatpush.bf16.msra.mxu0 %v3262_v33  ;;  %v3399_v43 = vld [vmem:[%s4449_s9] ss:$0 sm:$0xff] }
 0x1e1   : > { %1432 = vmatpush.bf16.xpose.msra.mxu3 %v1410_v56  ;;  %v1409_v61 = vpack.c.bf16 %v1326_v60, %v1324_v57  ;;  %v1178_v56 = vperm.slane %v3884_v39, 1 }
 0x1e4   : > { %1364 = vmatpush.bf16.msra.mxu2 %v2766_v51  ;;  %1148 = vmatpush.bf16.msra.mxu0 %v3261_v24 }
 0x1e8   : > { %1365 = vmatpush.bf16.msra.mxu2 %v2758_v45  ;;  %1149 = vmatpush.bf16.msra.mxu0 %v3260_v31 }
 0x1e9   : > { %1433 = vmatpush.bf16.xpose.msra.mxu3 %v1409_v61 }
 0x1eb   : > { %1366 = vmatmul.bf16.vlgmr.msra.gmra.mxu2 %v3832_v10 }
 0x1ec   : > { %1150 = vmatpush.bf16.msra.mxu0 %v3259_v41 }
 0x1f0   : > { %1151 = vmatpush.bf16.msra.mxu0 %v3258_v40 }
 0x1f1   : > { %1434 = vmatpush.bf16.xpose.msra.mxu3 %v1408_v35 }
 0x1f4   : > { %1152 = vmatpush.bf16.msra.mxu0 %v3257_v63 }
 0x1fb   : > { %1371 = vmatmul.bf16.gmra.mxu2 %v3838_v11 }
 0x20b   : > { %1376 = vmatmul.bf16.gmra.mxu2 %v3842_v12 }
 0x21b   : > { %1381 = vmatmul.bf16.gmra.mxu2 %v3846_v13 }
 0x22b   : > { %1386 = vmatmul.bf16.gmra.mxu2 %v3850_v14 }
 0x23b   : > { %1391 = vmatmul.bf16.gmra.mxu2 %v3854_v15 }
 0x24b   : > { %1396 = vmatmul.bf16.gmra.mxu2 %v3858_v17 }
 0x252   : > { %v1054_v0 = vpop.xlane.xlu1 %1053 }
 0x253   : > { %v1055_v1 = vmul.f32 0.03125, %v1054_v0 }
 0x255   : > { %v1056_v2 = vadd.f32 1e-05, %v1055_v1 }
 0x257   : > { %3412 = vrsqrt.f32 %v1056_v2  ;;  %vm1063_vm6 = vweird.f32 %v1056_v2 }
 0x25b   : > { %1401 = vmatmul.bf16.gmra.mxu2 %v3862_v21 }
 0x25d   : > { %v3413_v3 = vpop.eup %3412 }
 0x25e   : > { %v1058_v4 = vmul.f32 %v3413_v3, %v1056_v2  ;;  %vm1064_vm5 = vweird.f32 %v3413_v3 }
 0x25f   : > { %vm1065_vm7 = vmor %vm1063_vm6, %vm1064_vm5 }
 0x260   : > { %v1059_v5 = vmul.f32 %v3413_v3, %v1058_v4 }
 0x262   : > { %v1060_v6 = vmul.f32 0.5, %v1059_v5 }
 0x264   : > { %v1061_v7 = vsub.f32 1.5, %v1060_v6 }
 0x266   : > { %v1062_v9 = vmul.f32 %v3413_v3, %v1061_v7 }
 0x268   : > { %v1066_v18 = vsel %vm1065_vm7, %v3413_v3, %v1062_v9 }
 0x269   : > { %v1067_v19 = vmul.f32 %v1066_v18, %v3895_v59 }
 0x26b   : > { %v1071_v22 = vmul.f32 %v3397_v16, %v1067_v19  ;;  %v4023_v19 = vld [vmem:[%s677_s28] ss:$0 sm:$0xff]  ;;  %s4500_s28 = sld [smem:[#allocation18_spill]] }
 0x26d   : > { %v4005_v23 = vadd.f32 %v3398_v20, %v1071_v22 }
 0x26e   : > { %v1367_v26 = vpop.f32.mrf.mxu2 }
 0x26f   : > { %v1076_v25 = vpack.c.bf16 %v4005_v23, %v4005_v23  ;;  %v1368_v7 = vadd.f32 %v1367_v26, %v1178_v56  ;;  %v3288_v26 = vld [vmem:[%s4452_s12 + $0x38] sm:$0xff] }
 0x271   : > { %1153 = vmatmul.bf16.vlgmr.msra.gmra.mxu0 %v1076_v25 }
 0x276   : > { %v1369_v27 = vpop.f32.mrf.mxu2 }
 0x277   : > { %v1370_v9 = vadd.f32 %v1369_v27, %v1178_v56  ;;  %v3287_v27 = vld [vmem:[%s4452_s12 + $0x30] sm:$0xff] }
 0x279   : > { %v1416_v18 = vpack.c.bf16 %v1370_v9, %v1368_v7  ;;  %v3291_v7 = vld [vmem:[%s4446_s6 + $0xd0] sm:$0xff]  ;;  %v3310_v9 = vld [vmem:[%s4446_s6 + $0x168] sm:$0xff] }
 0x27e   : > { %v1372_v28 = vpop.f32.mrf.mxu2 }
 0x27f   : > { %v1373_v4 = vadd.f32 %v1372_v28, %v1178_v56  ;;  %v3286_v28 = vld [vmem:[%s4452_s12 + $0x28] sm:$0xff] }
 0x286   : > { %v1374_v29 = vpop.f32.mrf.mxu2 }
 0x287   : > { %v1375_v5 = vadd.f32 %v1374_v29, %v1178_v56  ;;  %v3285_v29 = vld [vmem:[%s4452_s12 + $0x20] sm:$0xff] }
 0x289   : > { %v1417_v16 = vpack.c.bf16 %v1375_v5, %v1373_v4  ;;  %v3312_v4 = vld [vmem:[%s4446_s6 + $0x178] sm:$0xff] }
 0x28a   : > { %v3292_v5 = vld [vmem:[%s4446_s6 + $0xd8] sm:$0xff] }
 0x28e   : > { %v1377_v59 = vpop.f32.mrf.mxu2 }
 0x28f   : > { %v1378_v39 = vadd.f32 %v1377_v59, %v1178_v56 }
 0x296   : > { %v1379_v30 = vpop.f32.mrf.mxu2 }
 0x297   : > { %v1380_v2 = vadd.f32 %v1379_v30, %v1178_v56 }
 0x299   : > { %v1418_v6 = vpack.c.bf16 %v1380_v2, %v1378_v39  ;;  %v3298_v39 = vld [vmem:[%s4446_s6 + $0x108] sm:$0xff]  ;;  %v3293_v2 = vld [vmem:[%s4446_s6 + $0xe0] sm:$0xff] }
 0x29e   : > { %v1382_v38 = vpop.f32.mrf.mxu2 }
 0x29f   : > { %v1383_v63 = vadd.f32 %v1382_v38, %v1178_v56 }
 0x2a6   : > { %v1384_v42 = vpop.f32.mrf.mxu2 }
 0x2a7   : > { %v1385_v0 = vadd.f32 %v1384_v42, %v1178_v56 }
 0x2a9   : > { %v1419_v3 = vpack.c.bf16 %v1385_v0, %v1383_v63  ;;  %v3295_v63 = vld [vmem:[%s4446_s6 + $0xf0] sm:$0xff] }
 0x2aa   : > { %v3299_v0 = vld [vmem:[%s4446_s6 + $0x110] sm:$0xff] }
 0x2ae   : > { %v1387_v44 = vpop.f32.mrf.mxu2 }
 0x2af   : > { %v1388_v31 = vadd.f32 %v1387_v44, %v1178_v56  ;;  %v3284_v44 = vld [vmem:[%s4452_s12 + $0x18] sm:$0xff] }
 0x2b6   : > { %v1389_v51 = vpop.f32.mrf.mxu2 }
 0x2b7   : > { %v1390_v41 = vadd.f32 %v1389_v51, %v1178_v56 }
 0x2b9   : > { %v1420_v1 = vpack.c.bf16 %v1390_v41, %v1388_v31  ;;  %v3301_v31 = vld [vmem:[%s4446_s6 + $0x120] sm:$0xff]  ;;  %v3296_v41 = vld [vmem:[%s4446_s6 + $0xf8] sm:$0xff] }
 0x2be   : > { %v1392_v37 = vpop.f32.mrf.mxu2 }
 0x2bf   : > { %v1393_v32 = vadd.f32 %v1392_v37, %v1178_v56 }
 0x2c6   : > { %v1394_v45 = vpop.f32.mrf.mxu2 }
 0x2c7   : > { %v1395_v33 = vadd.f32 %v1394_v45, %v1178_v56 }
 0x2c9   : > { %v1421_v40 = vpack.c.bf16 %v1395_v33, %v1393_v32 }
 0x2ce   : > { %v1397_v52 = vpop.f32.mrf.mxu2 }
 0x2cf   : > { %v1398_v61 = vadd.f32 %v1397_v52, %v1178_v56 }
 0x2d6   : > { %v1399_v53 = vpop.f32.mrf.mxu2 }
 0x2d7   : > { %v1400_v62 = vadd.f32 %v1399_v53, %v1178_v56  ;;  %v3401_v53 = vld [vmem:[%s4453_s13] ss:$0 sm:$0xff] }
 0x2d9   : > { %v1422_v24 = vpack.c.bf16 %v1400_v62, %v1398_v61  ;;  %v3304_v61 = vld [vmem:[%s4446_s6 + $0x138] sm:$0xff]  ;;  %v3303_v62 = vld [vmem:[%s4446_s6 + $0x130] sm:$0xff] }
 0x2da   : > { %1666 = vmatpush.bf16.msrb.mxu3 %v3304_v61 }
 0x2de   : > { %v1402_v54 = vpop.f32.mrf.mxu2  ;;  %1667 = vmatpush.bf16.msrb.mxu3 %v3303_v62  ;;  %v3100_v62 = vld [vmem:[%s4450_s10 + $0xc0] sm:$0xf] }
 0x2df   : > { %v1403_v57 = vadd.f32 %v1402_v54, %v1178_v56 }
 0x2e6   : > { %v1404_v60 = vpop.f32.mrf.mxu2 }
 0x2e7   : > { %v1405_v34 = vadd.f32 %v1404_v60, %v1178_v56 }
 0x2e9   : > { %v1423_v35 = vpack.c.bf16 %v1405_v34, %v1403_v57  ;;  %v3302_v34 = vld [vmem:[%s4446_s6 + $0x128] sm:$0xff] }
 0x2ea   : > { %1668 = vmatpush.bf16.msrb.mxu3 %v3302_v34  ;;  %v3330_v34 = vld [vmem:[%s4450_s10 + $0xc4] sm:$0xf0] }
 0x2eb   : > { %1448 = vmatpush.bf16.msrb.mxu0 %v1423_v35 }
 0x2ee   : > { %v1154_v46 = vpop.f32.mrf.mxu0  ;;  %1669 = vmatpush.bf16.msrb.mxu3 %v3301_v31 }
 0x2ef   : > { %v1155_v48 = vadd.f32 %v3399_v43, %v1154_v46  ;;  %1449 = vmatpush.bf16.msrb.mxu0 %v1422_v24  ;;  %v3283_v46 = vld [vmem:[%s4452_s12 + $0x10] sm:$0xff] }
 0x2f1   : > { %v1158_v49 = vmul.f32 0.17677669, %v1155_v48  ;;  %v3282_v48 = vld [vmem:[%s4452_s12 + $0x8] sm:$0xff] }
 0x2f3   : > { %v1407_v50 = vpack.c.bf16 %v1158_v49, %v1158_v49  ;;  %1450 = vmatpush.bf16.msrb.mxu0 %v1421_v40  ;;  %v3281_v49 = vld [vmem:[%s4452_s12] sm:$0xff]  ;;  %v3300_v40 = vld [vmem:[%s4446_s6 + $0x118] sm:$0xff] }
 0x2f4   : > { %1670 = vmatpush.bf16.msrb.mxu3 %v3300_v40 }
 0x2f5   : > { %1435 = vmatmul.bf16.vlgmr.msra.gmra.mxu3 %v1407_v50 }
 0x2f6   : > { %v1156_v36 = vpop.f32.mrf.mxu0 }
 0x2f7   : > { %1451 = vmatpush.bf16.msrb.mxu0 %v1420_v1  ;;  %v3294_v1 = vld [vmem:[%s4446_s6 + $0xe8] sm:$0xff] }
 0x2f8   : > { %1671 = vmatpush.bf16.msrb.mxu3 %v3299_v0  ;;  %v3084_v0 = vld [vmem:[%s4450_s10 + $0xa0] sm:$0xf] }
 0x2fb   : > { %1452 = vmatpush.bf16.msrb.mxu0 %v1419_v3  ;;  %v3297_v3 = vld [vmem:[%s4446_s6 + $0x100] sm:$0xff] }
 0x2fc   : > { %1672 = vmatpush.bf16.msrb.mxu3 %v3298_v39 }
 0x2ff   : > { %1453 = vmatpush.bf16.msrb.mxu0 %v1418_v6  ;;  %v3311_v6 = vld [vmem:[%s4446_s6 + $0x170] sm:$0xff] }
 0x300   : > { %1673 = vmatpush.bf16.msrb.mxu3 %v3297_v3  ;;  %v3324_v3 = vld [vmem:[%s4450_s10 + $0x94] sm:$0xf0] }
 0x303   : > { %1454 = vmatpush.bf16.msrb.mxu0 %v1417_v16  ;;  %v3290_v16 = vld [vmem:[%s4446_s6 + $0xc8] sm:$0xff] }
 0x304   : > { %1806 = vmatpush.bf16.msra.mxu3 %v3312_v4 }
 0x307   : > { %1455 = vmatpush.bf16.msrb.mxu0 %v1416_v18  ;;  %v3309_v18 = vld [vmem:[%s4446_s6 + $0x160] sm:$0xff] }
 0x308   : > { %1807 = vmatpush.bf16.msra.mxu3 %v3311_v6 }
 0x30b   : > { %1532 = vmatpush.bf16.msra.mxu0 %v3288_v26 }
 0x30c   : > { %1808 = vmatpush.bf16.msra.mxu3 %v3310_v9 }
 0x30f   : > { %1533 = vmatpush.bf16.msra.mxu0 %v3287_v27 }
 0x310   : > { %1809 = vmatpush.bf16.msra.mxu3 %v3309_v18 }
 0x313   : > { %1534 = vmatpush.bf16.msra.mxu0 %v3286_v28  ;;  %v3307_v28 = vld [vmem:[%s4446_s6 + $0x150] sm:$0xff] }
 0x317   : > { %1535 = vmatpush.bf16.msra.mxu0 %v3285_v29  ;;  %v3306_v29 = vld [vmem:[%s4446_s6 + $0x148] sm:$0xff] }
 0x31b   : > { %1536 = vmatpush.bf16.msra.mxu0 %v3284_v44  ;;  %v3124_v44 = vld [vmem:[%s4450_s10 + $0xf0] sm:$0xf] }
 0x31f   : > { %1537 = vmatpush.bf16.msra.mxu0 %v3283_v46  ;;  %v3336_v46 = vld [vmem:[%s4450_s10 + $0xf4] sm:$0xf0] }
 0x323   : > { %1538 = vmatpush.bf16.msra.mxu0 %v3282_v48  ;;  %v3116_v48 = vld [vmem:[%s4450_s10 + $0xe0] sm:$0xf] }
 0x327   : > { %1539 = vmatpush.bf16.msra.mxu0 %v3281_v49 }
 0x378   : > { %v1436_v20 = vpop.f32.mrf.mxu3 }
 0x379   : > { %v1437_v22 = vadd.f32 %v4023_v19, %v1436_v20  ;;  %v3289_v20 = vld [vmem:[%s4446_s6 + $0xc0] sm:$0xff] }
 0x37b   : > { %1440 = vmax.xlane.f32.xlu1 %v1437_v22 }
 0x380   : > { %v1438_v25 = vpop.f32.mrf.mxu3 }
 0x381   : > { %v3308_v25 = vld [vmem:[%s4446_s6 + $0x158] sm:$0xff] }
 0x382   : > { %1810 = vmatpush.bf16.msra.mxu3 %v3308_v25  ;;  %v4202_v25 = vld [vmem:[%s4451_s11 + $0x2] sm:$0x3] }
 0x386   : > { %1811 = vmatpush.bf16.msra.mxu3 %v3307_v28 }
 0x38a   : > { %1812 = vmatpush.bf16.msra.mxu3 %v3306_v29 }
 0x3ee   : > { %v1441_v59 = vpop.xlane.xlu1 %1440 }
 0x3ef   : > { %v1442_v30 = vsub.f32 %v1437_v22, %v1441_v59  ;;  %v3305_v59 = vld [vmem:[%s4446_s6 + $0x140] sm:$0xff] }
 0x3f0   : > { %1813 = vmatpush.bf16.msra.mxu3 %v3305_v59 }
 0x3f1   : > { %v1443_v38 = vmul.f32 1.442695, %v1442_v30 }
 0x3f3   : > { %3414 = vpow2.f32 %v1443_v38 }
 0x3f9   : > { %v3415_v42 = vpop.eup %3414 }
 0x3fa   : > { %1445 = vadd.xlane.f32.xlu2 %v3415_v42  ;;  %v1447_v43 = vpack.c.bf16 %v3415_v42, %v3415_v42 }
 0x3fc   : > { %1456 = vmatmul.bf16.vlgmr.msrb.gmra.mxu0 %v1447_v43 }
 0x3fd   : > { %1727 = vmatpush.bf16.msrb.mxu0 %v3296_v41 }
 0x401   : > { %1728 = vmatpush.bf16.msrb.mxu0 %v3295_v63 }
 0x405   : > { %1729 = vmatpush.bf16.msrb.mxu0 %v3294_v1  ;;  %v3326_v1 = vld [vmem:[%s4450_s10 + $0xa4] sm:$0xf0] }
 0x406   : > { %v3085_v39 = vor.u32 %v3326_v1, %v3084_v0 }
 0x409   : > { %1730 = vmatpush.bf16.msrb.mxu0 %v3293_v2  ;;  %v3076_v2 = vld [vmem:[%s4450_s10 + $0x90] sm:$0xf] }
 0x40a   : > { %v3077_v4 = vor.u32 %v3324_v3, %v3076_v2 }
 0x40d   : > { %1731 = vmatpush.bf16.msrb.mxu0 %v3292_v5  ;;  %v3068_v5 = vld [vmem:[%s4450_s10 + $0x80] sm:$0xf] }
 0x411   : > { %1732 = vmatpush.bf16.msrb.mxu0 %v3291_v7  ;;  %v3069_v7 = vor.u32 %v3322_v58, %v3068_v5 }
 0x415   : > { %1733 = vmatpush.bf16.msrb.mxu0 %v3290_v16 }
 0x419   : > { %1734 = vmatpush.bf16.msrb.mxu0 %v3289_v20 }
 0x46d   : > { %v1446_v50 = vpop.xlane.xlu2 %1445 }
 0x46e   : > { %3416 = vrcp.f32 %v1446_v50  ;;  %v3125_v50 = vor.u32 %v3336_v46, %v3124_v44 }
 0x470   : > { %2050 = vmatpush.bf16.msrb.mxu1 %v3125_v50 }
 0x474   : > { %v3417_v51 = vpop.eup %3416 }
 0x479   : > { %v1457_v36 = vpop.f32.mrf.mxu0 }
 0x47a   : > { %v1462_v37 = vmul.f32 %v3417_v51, %v1457_v36  ;;  %v3334_v51 = vld [vmem:[%s4450_s10 + $0xe4] sm:$0xf0]  ;;  %v3402_v36 = vld [vmem:[%s4456_s16] ss:$0 sm:$0xff] }
 0x47c   : > { %v1463_v45 = vpack.c.bf16 %v1462_v37, %v1462_v37 }
 0x47e   : > { %1540 = vmatmul.bf16.vlgmr.msra.gmra.mxu0 %v1463_v45  ;;  %v3117_v45 = vor.u32 %v3334_v51, %v3116_v48 }
 0x480   : > { %2051 = vmatpush.bf16.msrb.mxu1 %v3117_v45 }
 0x481   : > { %v1459_v52 = vpop.f32.mrf.mxu0 }
 0x482   : > { %v3108_v52 = vld [vmem:[%s4450_s10 + $0xd0] sm:$0xf] }
 0x4fb   : > { %v1541_v54 = vpop.f32.mrf.mxu0 }
 0x4fc   : > { %v1542_v56 = vadd.f32 %v3401_v53, %v1541_v54  ;;  %v3332_v53 = vld [vmem:[%s4450_s10 + $0xd4] sm:$0xf0] }
 0x4fe   : > { %v1545_v57 = vadd.f32 %v1542_v56, %v4005_v23  ;;  %v3403_v56 = vld [vmem:[%s4457_s17] ss:$0 sm:$0xff] }
 0x500   : > { %1548 = vadd.xlane.f32.xlu2 %v1545_v57 }
 0x503   : > { %v1543_v60 = vpop.f32.mrf.mxu0 }
 0x504   : > { %v3109_v60 = vor.u32 %v3332_v53, %v3108_v52 }
 0x506   : > { %2052 = vmatpush.bf16.msrb.mxu1 %v3109_v60 }
 0x573   : > { %v1549_v35 = vpop.xlane.xlu2 %1548 }
 0x574   : > { %v1550_v32 = vmul.f32 0.03125, %v1549_v35 }
 0x576   : > { %v1551_v23 = vsub.f32 %v1545_v57, %v1550_v32  ;;  %v3101_v32 = vor.u32 %v3330_v34, %v3100_v62 }
 0x578   : > { %v4064_v33 = vmul.f32 %v3892_v55, %v1551_v23  ;;  %2053 = vmatpush.bf16.msrb.mxu1 %v3101_v32 }
 0x57a   : > { %v1553_v24 = vmul.f32 %v4064_v33, %v4064_v33 }
 0x57c   : > { %1554 = vadd.xlane.f32.xlu1 %v1553_v24  ;;  %v3328_v24 = vld [vmem:[%s4450_s10 + $0xb4] sm:$0xf0] }
 0x5ef   : > { %v1555_v22 = vpop.xlane.xlu1 %1554 }
 0x5f0   : > { %v1556_v26 = vmul.f32 0.03125, %v1555_v22 }
 0x5f2   : > { %v1557_v27 = vadd.f32 1e-05, %v1556_v26 }
 0x5f4   : > { %3418 = vrsqrt.f32 %v1557_v27  ;;  %vm1564_vm9 = vweird.f32 %v1557_v27 }
 0x5fa   : > { %v3419_v30 = vpop.eup %3418 }
 0x5fb   : > { %v1559_v38 = vmul.f32 %v3419_v30, %v1557_v27  ;;  %vm1565_vm8 = vweird.f32 %v3419_v30  ;;  %v3404_v27 = vld [vmem:[%s4447_s7 + $0x1] ss:$0 sm:$0xff] }
 0x5fc   : > { %vm1566_vm10 = vmor %vm1564_vm9, %vm1565_vm8 }
 0x5fd   : > { %v1560_v42 = vmul.f32 %v3419_v30, %v1559_v38 }
 0x5ff   : > { %v1561_v43 = vmul.f32 0.5, %v1560_v42 }
 0x601   : > { %v1562_v49 = vsub.f32 1.5, %v1561_v43 }
 0x603   : > { %v1563_v37 = vmul.f32 %v3419_v30, %v1562_v49 }
 0x605   : > { %v1567_v54 = vsel %vm1566_vm10, %v3419_v30, %v1563_v37 }
 0x606   : > { %v1568_v57 = vmul.f32 %v1567_v54, %v4064_v33  ;;  %v3092_v33 = vld [vmem:[%s4450_s10 + $0xb0] sm:$0xf] }
 0x607   : > { %v3093_v40 = vor.u32 %v3328_v24, %v3092_v33 }
 0x608   : > { %v1572_v61 = vmul.f32 %v3402_v36, %v1568_v57 }
 0x609   : > { %2054 = vmatpush.bf16.msrb.mxu1 %v3093_v40 }
 0x60a   : > { %v1576_v35 = vadd.f32 %v3403_v56, %v1572_v61 }
 0x60c   : > { %v1577_v23 = vmul.f32 %v1576_v35, %v3779_v47 }
 0x60d   : > { %2055 = vmatpush.bf16.msrb.mxu1 %v3085_v39 }
 0x60e   : > { %v1600_v31 = vpack.c.bf16 %v1577_v23, %v1577_v23  ;;  %v1578_v41 = vrot.slane %v1577_v23, 7  ;;  %v1580_v6 = vrot.slane %v1577_v23, 1 }
 0x610   : > { %1674 = vmatmul.bf16.vlgmr.msrb.gmra.mxu3 %v1600_v31  ;;  %v2944_v63 = vpack.c.bf16 %v1578_v41, %v1578_v41  ;;  %v2995_v9 = vpack.c.bf16 %v1580_v6, %v1580_v6 }
 0x611   : > { %2056 = vmatpush.bf16.msrb.mxu1 %v3077_v4 }
 0x612   : > { %2945 = vmatmul.msk.bf16.vlgmr.msrb.gmra.mxu0 %vm3797_vm1, %v2944_v63 }
 0x615   : > { %2057 = vmatpush.bf16.msrb.mxu1 %v3069_v7 }
 0x618   : > { %2058 = vmatmul.bf16.vlgmr.msrb.gmra.mxu1 %v3832_v10 }
 0x620   : > { %2996 = vmatmul.msk.bf16.vlgmr.msra.gmra.mxu3 %vm3827_vm3, %v2995_v9 }
 0x628   : > { %2063 = vmatmul.bf16.gmra.mxu1 %v3838_v11 }
 0x638   : > { %2068 = vmatmul.bf16.gmra.mxu1 %v3842_v12 }
 0x648   : > { %2073 = vmatmul.bf16.gmra.mxu1 %v3846_v13 }
 0x658   : > { %2078 = vmatmul.bf16.gmra.mxu1 %v3850_v14 }
 0x668   : > { %2083 = vmatmul.bf16.gmra.mxu1 %v3854_v15 }
 0x678   : > { %2088 = vmatmul.bf16.gmra.mxu1 %v3858_v17  ;;  %v1966_v17 = vperm.slane %v4202_v25, 0 }
 0x688   : > { %2093 = vmatmul.bf16.gmra.mxu1 %v3862_v21 }
 0x68f   : > { %v1736_v16 = vpop.f32.mrf.mxu0 }
 0x693   : > { %v1675_v18 = vpop.f32.mrf.mxu3 }
 0x694   : > { %v1737_v26 = vadd.f32 %v1736_v16, %v1675_v18  ;;  %v3335_v16 = vld [vmem:[%s4450_s10 + $0xf4] sm:$0xf]  ;;  %v3126_v18 = vld [vmem:[%s4450_s10 + $0xf8] sm:$0xf0] }
 0x695   : > { %v2059_v22 = vpop.f32.mrf.mxu1 }
 0x696   : > { %v4208_v21 = vadd.f32 %v2059_v22, %v1966_v17  ;;  %v3118_v22 = vld [vmem:[%s4450_s10 + $0xe8] sm:$0xf0] }
 0x697   : > { %v1738_v8 = vpop.f32.mrf.mxu0 }
 0x698   : > { %v3333_v8 = vld [vmem:[%s4450_s10 + $0xe4] sm:$0xf] }
 0x69b   : > { %v1677_v20 = vpop.f32.mrf.mxu3 }
 0x69c   : > { %v3129_v20 = vor.u32 %v3335_v16, %v3126_v18 }
 0x69d   : > { %v2061_v30 = vpop.f32.mrf.mxu1 }
 0x69e   : > { %v4210_v42 = vadd.f32 %v2061_v30, %v1966_v17  ;;  %2099 = vmatpush.bf16.msrb.mxu2 %v3129_v20  ;;  %v3110_v30 = vld [vmem:[%s4450_s10 + $0xd8] sm:$0xf0] }
 0x6a0   : > { %v2149_v44 = vpack.c.bf16 %v4210_v42, %v4208_v21  ;;  %v3315_v21 = vld [vmem:[%s4448_s8 + $0x50] sm:$0xff]  ;;  %v3313_v42 = vld [vmem:[%s4448_s8 + $0x40] sm:$0xff] }
 0x6a3   : > { %v1815_v28 = vpop.f32.mrf.mxu3 }
 0x6a4   : > { %v1819_v29 = vadd.f32 %v1815_v28, %v1737_v26  ;;  %v3121_v26 = vor.u32 %v3333_v8, %v3118_v22 }
 0x6a5   : > { %v2064_v48 = vpop.f32.mrf.mxu1 }
 0x6a6   : > { %v1825_v59 = vadd.f32 %v3404_v27, %v1819_v29  ;;  %v4214_v49 = vadd.f32 %v2064_v48, %v1966_v17  ;;  %2100 = vmatpush.bf16.msrb.mxu2 %v3121_v26 }
 0x6a8   : > { %v1826_v38 = vmax.f32 %v1825_v59, 0.0  ;;  %v3331_v59 = vld [vmem:[%s4450_s10 + $0xd4] sm:$0xf] }
 0x6aa   : > { %v1827_v43 = vadd.f32 %v1826_v38, %v1576_v35  ;;  %v3329_v38 = vld [vmem:[%s4450_s10 + $0xc4] sm:$0xf] }
 0x6ab   : > { %v1817_v46 = vpop.f32.mrf.mxu3 }
 0x6ac   : > { %1832 = vadd.xlane.f32.xlu2 %v1827_v43  ;;  %v3102_v46 = vld [vmem:[%s4450_s10 + $0xc8] sm:$0xf0] }
 0x6ad   : > { %v2066_v50 = vpop.f32.mrf.mxu1 }
 0x6ae   : > { %v4216_v51 = vadd.f32 %v2066_v50, %v1966_v17  ;;  %v3327_v50 = vld [vmem:[%s4450_s10 + $0xb4] sm:$0xf] }
 0x6b0   : > { %v2150_v36 = vpack.c.bf16 %v4216_v51, %v4214_v49 }
 0x6b5   : > { %v2069_v37 = vpop.f32.mrf.mxu1 }
 0x6b6   : > { %v4220_v45 = vadd.f32 %v2069_v37, %v1966_v17  ;;  %v3094_v37 = vld [vmem:[%s4450_s10 + $0xb8] sm:$0xf0] }
 0x6bd   : > { %v2071_v52 = vpop.f32.mrf.mxu1 }
 0x6be   : > { %v4222_v53 = vadd.f32 %v2071_v52, %v1966_v17  ;;  %v3325_v52 = vld [vmem:[%s4450_s10 + $0xa4] sm:$0xf] }
 0x6c0   : > { %v2151_v54 = vpack.c.bf16 %v4222_v53, %v4220_v45  ;;  %v3318_v45 = vld [vmem:[%s4448_s8 + $0x68] sm:$0xff] }
 0x6c5   : > { %v2074_v56 = vpop.f32.mrf.mxu1 }
 0x6c6   : > { %v4226_v57 = vadd.f32 %v2074_v56, %v1966_v17  ;;  %v3097_v56 = vor.u32 %v3327_v50, %v3094_v37 }
 0x6cd   : > { %v2076_v60 = vpop.f32.mrf.mxu1 }
 0x6ce   : > { %v4228_v61 = vadd.f32 %v2076_v60, %v1966_v17  ;;  %v3086_v60 = vld [vmem:[%s4450_s10 + $0xa8] sm:$0xf0] }
 0x6d0   : > { %v2152_v62 = vpack.c.bf16 %v4228_v61, %v4226_v57 }
 0x6d5   : > { %v2079_v34 = vpop.f32.mrf.mxu1 }
 0x6d6   : > { %v2080_v35 = vadd.f32 %v2079_v34, %v1966_v17  ;;  %v3089_v34 = vor.u32 %v3325_v52, %v3086_v60 }
 0x6dd   : > { %v2081_v32 = vpop.f32.mrf.mxu1 }
 0x6de   : > { %v2082_v23 = vadd.f32 %v2081_v32, %v1966_v17  ;;  %v3078_v32 = vld [vmem:[%s4450_s10 + $0x98] sm:$0xf0] }
 0x6e0   : > { %v2153_v33 = vpack.c.bf16 %v2082_v23, %v2080_v35  ;;  %v3323_v35 = vld [vmem:[%s4450_s10 + $0x94] sm:$0xf]  ;;  %v3321_v23 = vld [vmem:[%s4450_s10 + $0x84] sm:$0xf] }
 0x6e5   : > { %v2084_v24 = vpop.f32.mrf.mxu1 }
 0x6e6   : > { %v2085_v28 = vadd.f32 %v2084_v24, %v1966_v17  ;;  %v3081_v24 = vor.u32 %v3323_v35, %v3078_v32 }
 0x6ed   : > { %v2086_v31 = vpop.f32.mrf.mxu1 }
 0x6ee   : > { %v2087_v29 = vadd.f32 %v2086_v31, %v1966_v17  ;;  %v3070_v31 = vld [vmem:[%s4450_s10 + $0x88] sm:$0xf0] }
 0x6f0   : > { %v2154_v48 = vpack.c.bf16 %v2087_v29, %v2085_v28 }
 0x6f5   : > { %v2089_v41 = vpop.f32.mrf.mxu1 }
 0x6f6   : > { %v2090_v7 = vadd.f32 %v2089_v41, %v1966_v17  ;;  %v3073_v41 = vor.u32 %v3321_v23, %v3070_v31 }
 0x6fd   : > { %v2091_v40 = vpop.f32.mrf.mxu1 }
 0x6fe   : > { %v2092_v9 = vadd.f32 %v2091_v40, %v1966_v17 }
 0x700   : > { %v2155_v27 = vpack.c.bf16 %v2092_v9, %v2090_v7 }
 0x705   : > { %v2094_v39 = vpop.f32.mrf.mxu1 }
 0x706   : > { %v2095_v4 = vadd.f32 %v2094_v39, %v1966_v17 }
 0x70d   : > { %v2096_v5 = vpop.f32.mrf.mxu1 }
 0x70e   : > { %v2097_v58 = vadd.f32 %v2096_v5, %v1966_v17  ;;  %v3105_v17 = vor.u32 %v3329_v38, %v3102_v46 }
 0x710   : > { %v2156_v6 = vpack.c.bf16 %v2097_v58, %v2095_v4  ;;  %v3429_v4 = vld [vmem:[%s3825_s20 + $0x38] sm:$0xff]  ;;  %v1967_v58 = vperm.slane %v4202_v25, 1  ;;  %v3407_v25 = vld [vmem:[%s4449_s9 + $0x1] ss:$0 sm:$0xff] }
 0x712   : > { %2165 = vmatpush.bf16.xpose.msrb.mxu3 %v2156_v6 }
 0x71a   : > { %2166 = vmatpush.bf16.xpose.msrb.mxu3 %v2155_v27 }
 0x71f   : > { %v1833_v63 = vpop.xlane.xlu2 %1832 }
 0x720   : > { %v1834_v0 = vmul.f32 0.03125, %v1833_v63  ;;  %v3428_v63 = vld [vmem:[%s3825_s20 + $0x30] sm:$0xff]  ;;  %s2418_s20 = sshll.u32 %s2414_s0, 4  ;;  %s2419_s20 = int_to_ptr.hbm [resolvable:$true] %s2418_s20 }
 0x721   : > { %s3444_s5 = sshra.s32 %s2419_s20, 4  ;;  %s3445_s5 = int_to_ptr.hbm [resolvable:$true] %s3444_s5 }
 0x722   : > { %v1835_v1 = vsub.f32 %v1827_v43, %v1834_v0  ;;  %v3113_v43 = vor.u32 %v3331_v59, %v3110_v30  ;;  %2167 = vmatpush.bf16.xpose.msrb.mxu3 %v2154_v48  ;;  %s3446_s3 = scalar_lea.hbm %s3445_s5, 8  ;;  %p3451_p1 = scmp.lt.s32.totalorder %s3445_s5, %s4501_s19 }
 0x723   : > { %p3447_p12 = scmp.ne.s32.totalorder %s3445_s5, %s3446_s3  ;;  %p3452_p2 = scmp.lt.s32.totalorder %s3450_s23, %s3446_s3 }
 0x724   : > { %v4233_v2 = vmul.f32 %v3892_v55, %v1835_v1  ;;  %2101 = vmatpush.bf16.msrb.mxu2 %v3113_v43 }
 0x725   : > { %p3448_p13 = pnand %p3447_p12, %p3639_p5  ;;  %p3453_p3 = por %p3452_p2, %p3451_p1 }
 0x726   : > { %v1837_v3 = vmul.f32 %v4233_v2, %v4233_v2 }
 0x727   : > { %p3449_p0 = pneg %p3448_p13 }
 0x728   : > { %1838 = vadd.xlane.f32.xlu1 %v1837_v3  ;;  %2102 = vmatpush.bf16.msrb.mxu2 %v3105_v17 }
 0x729   : > { %p3454_p4 = pnand %p3453_p3, %p3449_p0 }
 0x72a   : > { %2168 = vmatpush.bf16.xpose.msrb.mxu3 %v2153_v33  ;;  %v3320_v33 = vld [vmem:[%s4448_s8 + $0x78] sm:$0xff] }
 0x72b   : > { %1932 = vmatpush.bf16.msra.mxu0 %v3320_v33 }
 0x72c   : > { %2103 = vmatpush.bf16.msrb.mxu2 %v3097_v56 }
 0x730   : > { %2104 = vmatpush.bf16.msrb.mxu2 %v3089_v34 }
 0x732   : > { %2169 = vmatpush.bf16.xpose.msrb.mxu3 %v2152_v62  ;;  %v3405_v62 = vld [vmem:[%s4454_s14 + $0x1] ss:$0 sm:$0xff] }
 0x734   : > { %2105 = vmatpush.bf16.msrb.mxu2 %v3081_v24 }
 0x738   : > { %2106 = vmatpush.bf16.msrb.mxu2 %v3073_v41 }
 0x73a   : > { %2170 = vmatpush.bf16.xpose.msrb.mxu3 %v2151_v54 }
 0x73b   : > { %2107 = vmatmul.bf16.vlgmr.msrb.gmra.mxu2 %v3832_v10  ;;  %v3319_v10 = vld [vmem:[%s4448_s8 + $0x70] sm:$0xff] }
 0x73c   : > { %1933 = vmatpush.bf16.msra.mxu0 %v3319_v10 }
 0x740   : > { %1934 = vmatpush.bf16.msra.mxu0 %v3318_v45 }
 0x742   : > { %2171 = vmatpush.bf16.xpose.msrb.mxu3 %v2150_v36 }
 0x74a   : > { %2172 = vmatpush.bf16.xpose.msrb.mxu3 %v2149_v44 }
 0x74b   : > { %2112 = vmatmul.bf16.gmra.mxu2 %v3838_v11  ;;  %v3317_v11 = vld [vmem:[%s4448_s8 + $0x60] sm:$0xff] }
 0x74c   : > { %1935 = vmatpush.bf16.msra.mxu0 %v3317_v11 }
 0x75b   : > { %2117 = vmatmul.bf16.gmra.mxu2 %v3842_v12  ;;  %v3316_v12 = vld [vmem:[%s4448_s8 + $0x58] sm:$0xff] }
 0x75c   : > { %1936 = vmatpush.bf16.msra.mxu0 %v3316_v12 }
 0x760   : > { %1937 = vmatpush.bf16.msra.mxu0 %v3315_v21 }
 0x76b   : > { %2122 = vmatmul.bf16.gmra.mxu2 %v3846_v13  ;;  %v3314_v13 = vld [vmem:[%s4448_s8 + $0x48] sm:$0xff] }
 0x76c   : > { %1938 = vmatpush.bf16.msra.mxu0 %v3314_v13 }
 0x770   : > { %1939 = vmatpush.bf16.msra.mxu0 %v3313_v42 }
 0x77b   : > { %2127 = vmatmul.bf16.gmra.mxu2 %v3850_v14 }
 0x78b   : > { %2132 = vmatmul.bf16.gmra.mxu2 %v3854_v15  ;;  %v3406_v15 = vld [vmem:[%s4455_s15 + $0x1] ss:$0 sm:$0xff] }
 0x79b   : > { %v1839_v44 = vpop.xlane.xlu1 %1838  ;;  %2137 = vmatmul.bf16.gmra.mxu2 %v3428_v63 }
 0x79c   : > { %v1840_v49 = vmul.f32 0.03125, %v1839_v44 }
 0x79e   : > { %v1841_v51 = vadd.f32 1e-05, %v1840_v49 }
 0x7a0   : > { %3420 = vrsqrt.f32 %v1841_v51  ;;  %vm1848_vm12 = vweird.f32 %v1841_v51 }
 0x7a6   : > { %v3421_v36 = vpop.eup %3420 }
 0x7a7   : > { %v1843_v53 = vmul.f32 %v3421_v36, %v1841_v51  ;;  %vm1849_vm11 = vweird.f32 %v3421_v36 }
 0x7a8   : > { %vm1850_vm13 = vmor %vm1848_vm12, %vm1849_vm11 }
 0x7a9   : > { %v1844_v54 = vmul.f32 %v3421_v36, %v1843_v53 }
 0x7ab   : > { %v1845_v57 = vmul.f32 0.5, %v1844_v54  ;;  %2142 = vmatmul.bf16.gmra.mxu2 %v3429_v4  ;;  %v3339_v4 = vld [vmem:[%s4452_s12 + $0x50] sm:$0xff] }
 0x7ad   : > { %v1846_v61 = vsub.f32 1.5, %v1845_v57 }
 0x7af   : > { %v1847_v14 = vmul.f32 %v3421_v36, %v1846_v61  ;;  %v3344_v61 = vld [vmem:[%s4452_s12 + $0x78] sm:$0xff] }
 0x7b1   : > { %v1851_v40 = vsel %vm1850_vm13, %v3421_v36, %v1847_v14  ;;  %v3343_v14 = vld [vmem:[%s4452_s12 + $0x70] sm:$0xff] }
 0x7b2   : > { %v1852_v0 = vmul.f32 %v1851_v40, %v4233_v2 }
 0x7b4   : > { %v1856_v1 = vmul.f32 %v3405_v62, %v1852_v0  ;;  %v3342_v62 = vld [vmem:[%s4452_s12 + $0x68] sm:$0xff] }
 0x7b6   : > { %v4335_v39 = vadd.f32 %v3406_v15, %v1856_v1 }
 0x7b8   : > { %v1861_v3 = vpack.c.bf16 %v4335_v39, %v4335_v39 }
 0x7ba   : > { %1940 = vmatmul.bf16.vlgmr.msra.gmra.mxu0 %v1861_v3  ;;  %v3340_v3 = vld [vmem:[%s4452_s12 + $0x58] sm:$0xff] }
 0x7be   : > { %v2108_v5 = vpop.f32.mrf.mxu2 }
 0x7bf   : > { %v2109_v6 = vadd.f32 %v2108_v5, %v1967_v58  ;;  %v3338_v5 = vld [vmem:[%s4452_s12 + $0x48] sm:$0xff] }
 0x7c6   : > { %v2110_v7 = vpop.f32.mrf.mxu2 }
 0x7c7   : > { %v2111_v9 = vadd.f32 %v2110_v7, %v1967_v58 }
 0x7c9   : > { %v2157_v2 = vpack.c.bf16 %v2111_v9, %v2109_v6 }
 0x7ce   : > { %v2113_v16 = vpop.f32.mrf.mxu2 }
 0x7cf   : > { %v2114_v18 = vadd.f32 %v2113_v16, %v1967_v58 }
 0x7d6   : > { %v2115_v8 = vpop.f32.mrf.mxu2 }
 0x7d7   : > { %v2116_v20 = vadd.f32 %v2115_v8, %v1967_v58  ;;  %v3408_v8 = vld [vmem:[%s4453_s13 + $0x1] ss:$0 sm:$0xff] }
 0x7d9   : > { %v2158_v22 = vpack.c.bf16 %v2116_v20, %v2114_v18 }
 0x7de   : > { %v2118_v26 = vpop.f32.mrf.mxu2 }
 0x7df   : > { %v2119_v27 = vadd.f32 %v2118_v26, %v1967_v58 }
 0x7e6   : > { %v2120_v28 = vpop.f32.mrf.mxu2 }
 0x7e7   : > { %v2121_v29 = vadd.f32 %v2120_v28, %v1967_v58  ;;  %v3352_v28 = vld [vmem:[%s4458_s18 + $0x38] sm:$0xff] }
 0x7e8   : > { %2388 = vmatpush.bf16.msra.mxu3 %v3352_v28 }
 0x7e9   : > { %v2159_v59 = vpack.c.bf16 %v2121_v29, %v2119_v27 }
 0x7ee   : > { %v2123_v30 = vpop.f32.mrf.mxu2 }
 0x7ef   : > { %v2124_v38 = vadd.f32 %v2123_v30, %v1967_v58 }
 0x7f6   : > { %v2125_v43 = vpop.f32.mrf.mxu2 }
 0x7f7   : > { %v2126_v46 = vadd.f32 %v2125_v43, %v1967_v58 }
 0x7f9   : > { %v2160_v17 = vpack.c.bf16 %v2126_v46, %v2124_v38  ;;  %v3351_v46 = vld [vmem:[%s4458_s18 + $0x30] sm:$0xff] }
 0x7fa   : > { %2389 = vmatpush.bf16.msra.mxu3 %v3351_v46 }
 0x7fe   : > { %v2128_v48 = vpop.f32.mrf.mxu2 }
 0x7ff   : > { %v2129_v44 = vadd.f32 %v2128_v48, %v1967_v58  ;;  %v3346_v48 = vld [vmem:[%s4458_s18 + $0x8] sm:$0xff] }
 0x806   : > { %v2130_v60 = vpop.f32.mrf.mxu2 }
 0x807   : > { %v2131_v49 = vadd.f32 %v2130_v60, %v1967_v58 }
 0x809   : > { %v2161_v36 = vpack.c.bf16 %v2131_v49, %v2129_v44 }
 0x80e   : > { %v2133_v35 = vpop.f32.mrf.mxu2 }
 0x80f   : > { %v2134_v21 = vadd.f32 %v2133_v35, %v1967_v58 }
 0x816   : > { %v2135_v32 = vpop.f32.mrf.mxu2 }
 0x817   : > { %v2136_v13 = vadd.f32 %v2135_v32, %v1967_v58 }
 0x819   : > { %v2162_v51 = vpack.c.bf16 %v2136_v13, %v2134_v21  ;;  %v3411_v21 = vld [vmem:[%s4500_s28] ss:$0 sm:$0xff] }
 0x81e   : > { %v2138_v23 = vpop.f32.mrf.mxu2 }
 0x81f   : > { %v2139_v10 = vadd.f32 %v2138_v23, %v1967_v58 }
 0x826   : > { %v2140_v24 = vpop.f32.mrf.mxu2 }
 0x827   : > { %v2141_v45 = vadd.f32 %v2140_v24, %v1967_v58 }
 0x829   : > { %v2163_v42 = vpack.c.bf16 %v2141_v45, %v2139_v10  ;;  %v3410_v10 = vld [vmem:[%s4457_s17 + $0x1] ss:$0 sm:$0xff] }
 0x82e   : > { %v2143_v31 = vpop.f32.mrf.mxu2 }
 0x82f   : > { %v2144_v33 = vadd.f32 %v2143_v31, %v1967_v58  ;;  %v3409_v31 = vld [vmem:[%s4456_s16 + $0x1] ss:$0 sm:$0xff] }
 0x836   : > { %v2145_v41 = vpop.f32.mrf.mxu2 }
 0x837   : > { %v1941_v50 = vpop.f32.mrf.mxu0  ;;  %v2146_v11 = vadd.f32 %v2145_v41, %v1967_v58  ;;  %v3337_v58 = vld [vmem:[%s4452_s12 + $0x40] sm:$0xff] }
 0x838   : > { %v1942_v37 = vadd.f32 %v3407_v25, %v1941_v50  ;;  %v3347_v25 = vld [vmem:[%s4458_s18 + $0x10] sm:$0xff]  ;;  %v3345_v50 = vld [vmem:[%s4458_s18] sm:$0xff] }
 0x839   : > { %v2164_v12 = vpack.c.bf16 %v2146_v11, %v2144_v33 }
 0x83a   : > { %v1945_v52 = vmul.f32 0.17677669, %v1942_v37 }
 0x83b   : > { %2186 = vmatpush.bf16.msrb.mxu0 %v2164_v12 }
 0x83c   : > { %v2148_v56 = vpack.c.bf16 %v1945_v52, %v1945_v52 }
 0x83e   : > { %2173 = vmatmul.bf16.vlgmr.msrb.gmra.mxu3 %v2148_v56 }
 0x83f   : > { %v1943_v34 = vpop.f32.mrf.mxu0  ;;  %2187 = vmatpush.bf16.msrb.mxu0 %v2163_v42 }
 0x843   : > { %2188 = vmatpush.bf16.msrb.mxu0 %v2162_v51 }
 0x847   : > { %2189 = vmatpush.bf16.msrb.mxu0 %v2161_v36 }
 0x84b   : > { %2190 = vmatpush.bf16.msrb.mxu0 %v2160_v17  ;;  %v3349_v17 = vld [vmem:[%s4458_s18 + $0x20] sm:$0xff] }
 0x84f   : > { %2191 = vmatpush.bf16.msrb.mxu0 %v2159_v59 }
 0x853   : > { %2192 = vmatpush.bf16.msrb.mxu0 %v2158_v22 }
 0x857   : > { %2193 = vmatpush.bf16.msrb.mxu0 %v2157_v2 }
 0x85b   : > { %2272 = vmatpush.bf16.msra.mxu0 %v3344_v61 }
 0x85f   : > { %2273 = vmatpush.bf16.msra.mxu0 %v3343_v14 }
 0x863   : > { %2274 = vmatpush.bf16.msra.mxu0 %v3342_v62 }
 0x8c1   : > { %v2174_v53 = vpop.f32.mrf.mxu3 }
 0x8c2   : > { %v2175_v54 = vadd.f32 %v4023_v19, %v2174_v53  ;;  %v3341_v19 = vld [vmem:[%s4452_s12 + $0x60] sm:$0xff] }
 0x8c3   : > { %2275 = vmatpush.bf16.msra.mxu0 %v3341_v19 }
 0x8c4   : > { %2178 = vmax.xlane.f32.xlu2 %v2175_v54 }
 0x8c7   : > { %2276 = vmatpush.bf16.msra.mxu0 %v3340_v3 }
 0x8c9   : > { %v2176_v57 = vpop.f32.mrf.mxu3 }
 0x8cb   : > { %2277 = vmatpush.bf16.msra.mxu0 %v3339_v4 }
 0x8cf   : > { %2278 = vmatpush.bf16.msra.mxu0 %v3338_v5 }
 0x8d3   : > { %2279 = vmatpush.bf16.msra.mxu0 %v3337_v58 }
 0x937   : > { %v2179_v40 = vpop.xlane.xlu2 %2178 }
 0x938   : > { %v2180_v63 = vsub.f32 %v2175_v54, %v2179_v40 }
 0x93a   : > { %v2181_v0 = vmul.f32 1.442695, %v2180_v63 }
 0x93c   : > { %3422 = vpow2.f32 %v2181_v0 }
 0x942   : > { %v3423_v15 = vpop.eup %3422 }
 0x943   : > { %2183 = vadd.xlane.f32.xlu1 %v3423_v15  ;;  %v2185_v1 = vpack.c.bf16 %v3423_v15, %v3423_v15 }
 0x945   : > { %2194 = vmatmul.bf16.vlgmr.msrb.gmra.mxu0 %v2185_v1 }
 0x9b6   : > { %v2184_v6 = vpop.xlane.xlu1 %2183 }
 0x9b7   : > { %3424 = vrcp.f32 %v2184_v6 }
 0x9bd   : > { %v3425_v7 = vpop.eup %3424 }
 0x9c2   : > { %v2195_v9 = vpop.f32.mrf.mxu0 }
 0x9c3   : > { %v2200_v2 = vmul.f32 %v3425_v7, %v2195_v9 }
 0x9c5   : > { %v2201_v16 = vpack.c.bf16 %v2200_v2, %v2200_v2 }
 0x9c7   : > { %2280 = vmatmul.bf16.vlgmr.msra.gmra.mxu0 %v2201_v16 }
 0x9ca   : > { %v2197_v18 = vpop.f32.mrf.mxu0 }
 0xa44   : > { %v2281_v20 = vpop.f32.mrf.mxu0 }
 0xa45   : > { %v2282_v22 = vadd.f32 %v3408_v8, %v2281_v20 }
 0xa47   : > { %v2285_v26 = vadd.f32 %v2282_v22, %v4335_v39  ;;  %v3350_v39 = vld [vmem:[%s4458_s18 + $0x28] sm:$0xff] }
 0xa48   : > { %2390 = vmatpush.bf16.msra.mxu3 %v3350_v39 }
 0xa49   : > { %2290 = vadd.xlane.f32.xlu2 %v2285_v26 }
 0xa4c   : > { %v2283_v27 = vpop.f32.mrf.mxu0  ;;  %2391 = vmatpush.bf16.msra.mxu3 %v3349_v17 }
 0xabc   : > { %v2291_v29 = vpop.xlane.xlu2 %2290 }
 0xabd   : > { %v2292_v59 = vmul.f32 0.03125, %v2291_v29 }
 0xabf   : > { %v2293_v30 = vsub.f32 %v2285_v26, %v2292_v59 }
 0xac1   : > { %v2294_v38 = vmul.f32 %v3892_v55, %v2293_v30  ;;  %v3348_v55 = vld [vmem:[%s4458_s18 + $0x18] sm:$0xff] }
 0xac2   : > { %2392 = vmatpush.bf16.msra.mxu3 %v3348_v55 }
 0xac3   : > { %v2295_v43 = vmul.f32 %v2294_v38, %v2294_v38 }
 0xac5   : > { %2296 = vadd.xlane.f32.xlu1 %v2295_v43 }
 0xac6   : > { %2393 = vmatpush.bf16.msra.mxu3 %v3347_v25 }
 0xaca   : > { %2394 = vmatpush.bf16.msra.mxu3 %v3346_v48 }
 0xace   : > { %2395 = vmatpush.bf16.msra.mxu3 %v3345_v50 }
 0xb38   : > { %v2297_v37 = vpop.xlane.xlu1 %2296 }
 0xb39   : > { %v2298_v52 = vmul.f32 0.03125, %v2297_v37 }
 0xb3b   : > { %v2299_v56 = vadd.f32 1e-05, %v2298_v52 }
 0xb3d   : > { %3426 = vrsqrt.f32 %v2299_v56  ;;  %vm2306_vm15 = vweird.f32 %v2299_v56 }
 0xb43   : > { %v3427_v60 = vpop.eup %3426 }
 0xb44   : > { %v2301_v34 = vmul.f32 %v3427_v60, %v2299_v56  ;;  %vm2307_vm14 = vweird.f32 %v3427_v60 }
 0xb45   : > { %vm2308_vm0 = vmor %vm2306_vm15, %vm2307_vm14 }
 0xb46   : > { %v2302_v35 = vmul.f32 %v3427_v60, %v2301_v34 }
 0xb48   : > { %v2303_v32 = vmul.f32 0.5, %v2302_v35 }
 0xb4a   : > { %v2304_v23 = vsub.f32 1.5, %v2303_v32 }
 0xb4c   : > { %v2305_v24 = vmul.f32 %v3427_v60, %v2304_v23 }
 0xb4e   : > { %v2309_v33 = vsel %vm2308_vm0, %v3427_v60, %v2305_v24 }
 0xb4f   : > { %v2310_v41 = vmul.f32 %v2309_v33, %v2294_v38 }
 0xb51   : > { %v2314_v45 = vmul.f32 %v3409_v31, %v2310_v41 }
 0xb53   : > { %v2318_v11 = vadd.f32 %v3410_v10, %v2314_v45 }
 0xb55   : > { %v2319_v12 = vpack.c.bf16 %v2318_v11, %v2318_v11 }
 0xb57   : > { %2396 = vmatmul.bf16.vlgmr.msra.gmra.mxu3 %v2319_v12 }
 0xbda   : > { %v2397_v13 = vpop.f32.mrf.mxu3 }
 0xbdb   : > { %v2398_v42 = vadd.f32 %v3411_v21, %v2397_v13 }
 0xbdd   : > { %v2401_v44 = vmul.f32 %v2398_v42, %v3779_v47 }
 0xbdf   : > { %2402 = vst [vmem:[%s660_s4] sm:$0xff] %v2401_v44 }
 0xbe0   : > { %3457 = shalt.err (!%p3454_p4)
}
 0xbe1   : > { %3353 = dma.vmem_to_hbm [thread:$0]  (%p3639_p5), %s2417_s25, 128, %s2419_s20, %s2404_s2  }
 0xbe2   : > { %v2399_v47 = vpop.f32.mrf.mxu3 }
 0xbe3 PF: > { %s4503_s4 = sld [smem:[#allocation7_spill]] }
 0xbe4   : > { %s4504_s26 = sld [smem:[#allocation5_spill]] }
 0xbe9   : > { %p3359_p7 = scmp.ge.s32.totalorder %s4503_s4, 2 }
 0xbea   : > { %s2430_s0 = sand.u32 1, %s4504_s26  }
 0xbeb   : > { %p3356_p8 = pnand %p3359_p7, %p3643_p6  ;;  %s2431_s27 = scalar_lea.sflag [#allocation3], %s2430_s0 }
 0xbed   : > { %p3357_p9 = pneg %p3356_p8 }
 0xbef   : > { %3475 = dma.done.wait (%p3357_p9), %s2431_s27, 128  }
 0xbf0   : > { %3477 = vsyncadd (%p3357_p9), %s2431_s27, 4294967168  ;;  %s4506_s24 = sld [smem:[#allocation8_spill]]  ;;  %s4509_s1 = smov %s3484_s22 }
 0xbf1   : > { %s4507_s5 = sld [smem:[#allocation6_spill]] }
 0xbf2   : > { %s4508_s23 = sld [smem:[#allocation9_spill]] }
 0xbf6   : > { %p30_p10 = scmp.ge.s32.totalorder %s4506_s24, 4  }
 0xbf7   : > { %s4510_s22 = smov %s4507_s5 }
 0xbf8   :  { %32 = sbr.rel (!%p30_p10) target bundleno = 12 (0xc), region = 160 }
 0xbfd   :  { %2437 = vsyncpa [#allocation3], 1 }
 0xbfe   :  { %2439 = vsyncpa [#allocation3 + $0x1], 1 }

</bundles_post_ra>
